<compile_context>
chip_gen: v7x
topology: tpu7x:2x2x1
jax: 0.10.0
libtpu: 0.0.40
codegen_flags: <defaults>
</compile_context>

<pallas_src>
import functools

import jax
import jax.numpy as jnp
from jax.experimental import pallas as pl
from jax.experimental.pallas import tpu as pltpu


_VMEM_SPEC = pl.BlockSpec(memory_space=pltpu.MemorySpace.VMEM)
_FINAL_COUT_PAD = 128   # pad the 1-wide final conv to a lane-dense width


# ----------------------------------------------------------------------------
# Pallas kernel: fused conv-matmul + bias (+ BatchNorm) + activation
# ----------------------------------------------------------------------------

def _conv_fused_kernel(p_ref, w_ref, b_ref, o_ref, *, activation, batchnorm, eps):
    """(im2col patches @ W) on the MXU (bf16 in, f32 acc) + bias, optionally
    followed by training-mode BatchNorm2d (gamma=1, beta=0, biased variance
    over the M = N*H*W rows) and a LeakyReLU(0.2)/Sigmoid activation."""
    acc = jnp.dot(p_ref[...], w_ref[...], preferred_element_type=jnp.float32)
    acc = acc + b_ref[...]                              # (1, Cout) broadcast

    if batchnorm:
        # Single-pass batch statistics: one sum + one sum-of-squares reduction.
        m = acc.shape[0]
        inv_m = 1.0 / m
        s = jnp.sum(acc, axis=0, keepdims=True)
        sq = jnp.sum(acc * acc, axis=0, keepdims=True)
        mean = s * inv_m
        var = jnp.maximum(sq * inv_m - mean * mean, 0.0)  # biased var (PyTorch BN)
        acc = (acc - mean) * jax.lax.rsqrt(var + eps)     # rsqrt -> EUP slot

    if activation == "leaky_relu":
        acc = jnp.where(acc > 0, acc, 0.2 * acc)
    elif activation == "sigmoid":
        acc = jax.nn.sigmoid(acc)

    o_ref[...] = acc.astype(o_ref.dtype)


def conv_fused(patches, w, b, *, activation, batchnorm=False,
               out_dtype=jnp.bfloat16, eps=1e-5):
    """patches: (M, K) bf16, w: (K, Cout) bf16, b: (Cout,) f32 -> (M, Cout)."""
    M, K = patches.shape
    cout = w.shape[1]
    transcendentals = M * cout if activation == "sigmoid" else (cout if batchnorm else 0)
    cost = pl.CostEstimate(
        flops=2 * M * K * cout,
        transcendentals=transcendentals,
        bytes_accessed=(patches.size * patches.dtype.itemsize
                        + w.size * w.dtype.itemsize
                        + b.size * b.dtype.itemsize
                        + M * cout * jnp.dtype(out_dtype).itemsize),
    )
    return pl.pallas_call(
        functools.partial(_conv_fused_kernel, activation=activation,
                          batchnorm=batchnorm, eps=eps),
        out_shape=jax.ShapeDtypeStruct((M, cout), out_dtype),
        in_specs=[_VMEM_SPEC, _VMEM_SPEC, _VMEM_SPEC],
        out_specs=_VMEM_SPEC,
        cost_estimate=cost,
    )(patches, w, b.reshape(1, cout))


# ----------------------------------------------------------------------------
# Glue: im2col patch extraction + parameter setup (plain JAX / XLA)
# ----------------------------------------------------------------------------

def im2col(x, stride):
    """x: (N, H, W, C) NHWC, 3x3 kernel, pad=1. Returns ((N*Ho*Wo, 9*C), Ho, Wo)."""
    n, h, w, c = x.shape
    xp = jnp.pad(x, ((0, 0), (1, 1), (1, 1), (0, 0)))
    ho = (h + 2 - 3) // stride + 1
    wo = (w + 2 - 3) // stride + 1
    taps = []
    for dh in range(3):
        for dw in range(3):
            taps.append(
                xp[:, dh:dh + stride * (ho - 1) + 1:stride,
                      dw:dw + stride * (wo - 1) + 1:stride, :]
            )
    # (N, Ho, Wo, 9, C): tap index (dh, dw) major, input channel minor
    patches = jnp.stack(taps, axis=-2)
    return patches.reshape(n * ho * wo, 9 * c), ho, wo


def _conv_weight_to_matmul(w_oihw):
    """(Cout, Cin, 3, 3) -> (9*Cin, Cout), matching im2col's (kh, kw, cin) order."""
    cout, cin = w_oihw.shape[0], w_oihw.shape[1]
    return jnp.transpose(w_oihw, (2, 3, 1, 0)).reshape(9 * cin, cout)


def init_params(key, channels):
    """Deterministic init with the exact PyTorch parameter shapes."""
    shapes = [
        (64, channels * 2, 3, 3),
        (128, 64, 3, 3),
        (256, 128, 3, 3),
        (1, 256, 3, 3),
    ]
    params = {}
    for i, shp in enumerate(shapes, start=1):
        key, kw, kb = jax.random.split(key, 3)
        fan_in = shp[1] * shp[2] * shp[3]
        w = jax.random.normal(kw, shp, jnp.float32) * (2.0 / fan_in) ** 0.5
        b = jax.random.normal(kb, (shp[0],), jnp.float32) * 0.01
        wm = _conv_weight_to_matmul(w)                      # (9*Cin, Cout), f32
        if i == 4:
            # Pad the 1-wide final conv to 128 output lanes so the kernel's
            # store is lane-dense; the real result lives in column 0.
            wm = jnp.pad(wm, ((0, 0), (0, _FINAL_COUT_PAD - wm.shape[1])))
            b = jnp.pad(b, (0, _FINAL_COUT_PAD - b.shape[0]))
        params[f"w{i}"] = wm.astype(jnp.bfloat16)           # bf16 MXU operands
        params[f"b{i}"] = b                                 # bias stays f32
    return params


# ----------------------------------------------------------------------------
# Forward pass (mirrors nn.Sequential in the PyTorch module)
# ----------------------------------------------------------------------------

def discriminator_forward(params, x1, x2):
    # torch.cat([x1, x2], dim=1) in NCHW, then NHWC + bf16 for the kernels.
    x = jnp.concatenate([x1, x2], axis=1)                    # (N, 2C, H, W)
    x = jnp.transpose(x, (0, 2, 3, 1)).astype(jnp.bfloat16)  # NHWC, bf16
    n = x.shape[0]

    # Conv(2C -> 64, s=2) + LeakyReLU(0.2)
    p, ho, wo = im2col(x, stride=2)
    x = conv_fused(p, params["w1"], params["b1"],
                   activation="leaky_relu").reshape(n, ho, wo, 64)

    # Conv(64 -> 128, s=2) + BatchNorm2d(128) + LeakyReLU(0.2)   [fused]
    p, ho, wo = im2col(x, stride=2)
    x = conv_fused(p, params["w2"], params["b2"], activation="leaky_relu",
                   batchnorm=True).reshape(n, ho, wo, 128)

    # Conv(128 -> 256, s=2) + BatchNorm2d(256) + LeakyReLU(0.2)  [fused]
    p, ho, wo = im2col(x, stride=2)
    x = conv_fused(p, params["w3"], params["b3"], activation="leaky_relu",
                   batchnorm=True).reshape(n, ho, wo, 256)

    # Conv(256 -> 1, s=1) + Sigmoid: computed at lane-dense Cout=128, col 0 real.
    p, ho, wo = im2col(x, stride=1)
    y = conv_fused(p, params["w4"], params["b4"], activation="sigmoid",
                   out_dtype=jnp.float32)
    out = y[:, :1].reshape(n, ho, wo, 1)

    return jnp.transpose(out, (0, 3, 1, 2))      # back to NCHW: (N, 1, H/8, W/8)


# ----------------------------------------------------------------------------
# Demo
# ----------------------------------------------------------------------------

if __name__ == "__main__":
    channels, image_size, batch = 4, 16, 2

    key = jax.random.PRNGKey(0)
    k_params, k_x1, k_x2 = jax.random.split(key, 3)

    params = init_params(k_params, channels)
    x1 = jax.random.normal(k_x1, (batch, channels, image_size, image_size), jnp.float32)
    x2 = jax.random.normal(k_x2, (batch, channels, image_size, image_size), jnp.float32)

    fwd = jax.jit(discriminator_forward)
    out = fwd(params, x1, x2)
    out = jax.block_until_ready(out)

    assert out.shape == (batch, 1, image_size // 8, image_size // 8), out.shape
    assert bool(jnp.all(jnp.isfinite(out)))
    assert bool(jnp.all((out >= 0.0) & (out <= 1.0)))   # sigmoid output range
    print("KERNEL_OK")
</pallas_src>

<mosaic_0001>
module attributes {stable_mosaic.version = 11 : i64} {
  func.func @_conv_fused_kernel(%arg0: memref<128x72xbf16, #tpu.memory_space<vmem>>, %arg1: memref<72x64xbf16, #tpu.memory_space<vmem>>, %arg2: memref<1x64xf32, #tpu.memory_space<vmem>>, %arg3: memref<128x64xbf16, #tpu.memory_space<vmem>>) attributes {dimension_semantics = [], scalar_prefetch = 0 : i64, scratch_operands = 0 : i64, tpu.core_type = #tpu.core_type<tc>} {
    %c0 = arith.constant 0 : index
    %c0_0 = arith.constant 0 : index
    %0 = vector.load %arg0[%c0, %c0_0] : memref<128x72xbf16, #tpu.memory_space<vmem>>, vector<128x72xbf16>
    %c0_1 = arith.constant 0 : index
    %c0_2 = arith.constant 0 : index
    %1 = vector.load %arg1[%c0_1, %c0_2] : memref<72x64xbf16, #tpu.memory_space<vmem>>, vector<72x64xbf16>
    %cst = arith.constant dense<0.000000e+00> : vector<128x64xf32>
    %2 = tpu.matmul %0, %1, %cst {dimension_numbers = #tpu.dot_dimension_numbers<[1], [0], [0], [1], [0, 0, 1, 1], [], []>} : vector<128x72xbf16>, vector<72x64xbf16>, vector<128x64xf32> -> vector<128x64xf32>
    %c0_3 = arith.constant 0 : index
    %c0_4 = arith.constant 0 : index
    %3 = vector.load %arg2[%c0_3, %c0_4] : memref<1x64xf32, #tpu.memory_space<vmem>>, vector<1x64xf32>
    %4 = vector.broadcast %3 : vector<1x64xf32> to vector<128x64xf32>
    %5 = arith.addf %2, %4 : vector<128x64xf32>
    %cst_5 = arith.constant 0.000000e+00 : f32
    %6 = vector.broadcast %cst_5 : f32 to vector<128x64xf32>
    %7 = arith.cmpf ogt, %5, %6 : vector<128x64xf32>
    %cst_6 = arith.constant 2.000000e-01 : f32
    %8 = vector.broadcast %cst_6 : f32 to vector<128x64xf32>
    %9 = arith.mulf %8, %5 : vector<128x64xf32>
    %10 = arith.select %7, %5, %9 : vector<128x64xi1>, vector<128x64xf32>
    %11 = arith.truncf %10 : vector<128x64xf32> to vector<128x64xbf16>
    %c0_7 = arith.constant 0 : index
    %c0_8 = arith.constant 0 : index
    %12 = vector.load %arg3[%c0_7, %c0_8] : memref<128x64xbf16, #tpu.memory_space<vmem>>, vector<128x64xbf16>
    tpu.vector_store %arg3[%c0_7, %c0_8], %11 {strides = array<i32>} : memref<128x64xbf16, #tpu.memory_space<vmem>>, vector<128x64xbf16>,
    return
  }
}

module attributes {stable_mosaic.version = 11 : i64} {
  func.func @_conv_fused_kernel(%arg0: memref<32x576xbf16, #tpu.memory_space<vmem>>, %arg1: memref<576x128xbf16, #tpu.memory_space<vmem>>, %arg2: memref<1x128xf32, #tpu.memory_space<vmem>>, %arg3: memref<32x128xbf16, #tpu.memory_space<vmem>>) attributes {dimension_semantics = [], scalar_prefetch = 0 : i64, scratch_operands = 0 : i64, tpu.core_type = #tpu.core_type<tc>} {
    %c0 = arith.constant 0 : index
    %c0_0 = arith.constant 0 : index
    %0 = vector.load %arg0[%c0, %c0_0] : memref<32x576xbf16, #tpu.memory_space<vmem>>, vector<32x576xbf16>
    %c0_1 = arith.constant 0 : index
    %c0_2 = arith.constant 0 : index
    %1 = vector.load %arg1[%c0_1, %c0_2] : memref<576x128xbf16, #tpu.memory_space<vmem>>, vector<576x128xbf16>
    %cst = arith.constant dense<0.000000e+00> : vector<32x128xf32>
    %2 = tpu.matmul %0, %1, %cst {dimension_numbers = #tpu.dot_dimension_numbers<[1], [0], [0], [1], [0, 0, 1, 1], [], []>} : vector<32x576xbf16>, vector<576x128xbf16>, vector<32x128xf32> -> vector<32x128xf32>
    %c0_3 = arith.constant 0 : index
    %c0_4 = arith.constant 0 : index
    %3 = vector.load %arg2[%c0_3, %c0_4] : memref<1x128xf32, #tpu.memory_space<vmem>>, vector<1x128xf32>
    %4 = vector.broadcast %3 : vector<1x128xf32> to vector<32x128xf32>
    %5 = arith.addf %2, %4 : vector<32x128xf32>
    %cst_5 = arith.constant dense<0.000000e+00> : vector<128xf32>
    %6 = vector.multi_reduction <add>, %5, %cst_5 [0] : vector<32x128xf32> to vector<128xf32>
    %7 = vector.shape_cast %6 : vector<128xf32> to vector<1x128xf32>
    %8 = arith.mulf %5, %5 : vector<32x128xf32>
    %cst_6 = arith.constant dense<0.000000e+00> : vector<128xf32>
    %9 = vector.multi_reduction <add>, %8, %cst_6 [0] : vector<32x128xf32> to vector<128xf32>
    %10 = vector.shape_cast %9 : vector<128xf32> to vector<1x128xf32>
    %cst_7 = arith.constant 3.125000e-02 : f32
    %11 = vector.broadcast %cst_7 : f32 to vector<1x128xf32>
    %12 = arith.mulf %7, %11 : vector<1x128xf32>
    %cst_8 = arith.constant 3.125000e-02 : f32
    %13 = vector.broadcast %cst_8 : f32 to vector<1x128xf32>
    %14 = arith.mulf %10, %13 : vector<1x128xf32>
    %15 = arith.mulf %12, %12 : vector<1x128xf32>
    %16 = arith.subf %14, %15 : vector<1x128xf32>
    %cst_9 = arith.constant 0.000000e+00 : f32
    %17 = vector.broadcast %cst_9 : f32 to vector<1x128xf32>
    %18 = arith.maximumf %16, %17 : vector<1x128xf32>
    %19 = vector.broadcast %12 : vector<1x128xf32> to vector<32x128xf32>
    %20 = arith.subf %5, %19 : vector<32x128xf32>
    %cst_10 = arith.constant 9.99999974E-6 : f32
    %21 = vector.broadcast %cst_10 : f32 to vector<1x128xf32>
    %22 = arith.addf %18, %21 : vector<1x128xf32>
    %23 = math.rsqrt %22 : vector<1x128xf32>
    %24 = vector.broadcast %23 : vector<1x128xf32> to vector<32x128xf32>
    %25 = arith.mulf %20, %24 : vector<32x128xf32>
    %cst_11 = arith.constant 0.000000e+00 : f32
    %26 = vector.broadcast %cst_11 : f32 to vector<32x128xf32>
    %27 = arith.cmpf ogt, %25, %26 : vector<32x128xf32>
    %cst_12 = arith.constant 2.000000e-01 : f32
    %28 = vector.broadcast %cst_12 : f32 to vector<32x128xf32>
    %29 = arith.mulf %28, %25 : vector<32x128xf32>
    %30 = arith.select %27, %25, %29 : vector<32x128xi1>, vector<32x128xf32>
    %31 = arith.truncf %30 : vector<32x128xf32> to vector<32x128xbf16>
    %c0_13 = arith.constant 0 : index
    %c0_14 = arith.constant 0 : index
    %32 = vector.load %arg3[%c0_13, %c0_14] : memref<32x128xbf16, #tpu.memory_space<vmem>>, vector<32x128xbf16>
    tpu.vector_store %arg3[%c0_13, %c0_14], %31 {strides = array<i32>} : memref<32x128xbf16, #tpu.memory_space<vmem>>, vector<32x128xbf16>,
    return
  }
}

module attributes {stable_mosaic.version = 11 : i64} {
  func.func @_conv_fused_kernel(%arg0: memref<8x1152xbf16, #tpu.memory_space<vmem>>, %arg1: memref<1152x256xbf16, #tpu.memory_space<vmem>>, %arg2: memref<1x256xf32, #tpu.memory_space<vmem>>, %arg3: memref<8x256xbf16, #tpu.memory_space<vmem>>) attributes {dimension_semantics = [], scalar_prefetch = 0 : i64, scratch_operands = 0 : i64, tpu.core_type = #tpu.core_type<tc>} {
    %c0 = arith.constant 0 : index
    %c0_0 = arith.constant 0 : index
    %0 = vector.load %arg0[%c0, %c0_0] : memref<8x1152xbf16, #tpu.memory_space<vmem>>, vector<8x1152xbf16>
    %c0_1 = arith.constant 0 : index
    %c0_2 = arith.constant 0 : index
    %1 = vector.load %arg1[%c0_1, %c0_2] : memref<1152x256xbf16, #tpu.memory_space<vmem>>, vector<1152x256xbf16>
    %cst = arith.constant dense<0.000000e+00> : vector<8x256xf32>
    %2 = tpu.matmul %0, %1, %cst {dimension_numbers = #tpu.dot_dimension_numbers<[1], [0], [0], [1], [0, 0, 1, 1], [], []>} : vector<8x1152xbf16>, vector<1152x256xbf16>, vector<8x256xf32> -> vector<8x256xf32>
    %c0_3 = arith.constant 0 : index
    %c0_4 = arith.constant 0 : index
    %3 = vector.load %arg2[%c0_3, %c0_4] : memref<1x256xf32, #tpu.memory_space<vmem>>, vector<1x256xf32>
    %4 = vector.broadcast %3 : vector<1x256xf32> to vector<8x256xf32>
    %5 = arith.addf %2, %4 : vector<8x256xf32>
    %cst_5 = arith.constant dense<0.000000e+00> : vector<256xf32>
    %6 = vector.multi_reduction <add>, %5, %cst_5 [0] : vector<8x256xf32> to vector<256xf32>
    %7 = vector.shape_cast %6 : vector<256xf32> to vector<1x256xf32>
    %8 = arith.mulf %5, %5 : vector<8x256xf32>
    %cst_6 = arith.constant dense<0.000000e+00> : vector<256xf32>
    %9 = vector.multi_reduction <add>, %8, %cst_6 [0] : vector<8x256xf32> to vector<256xf32>
    %10 = vector.shape_cast %9 : vector<256xf32> to vector<1x256xf32>
    %cst_7 = arith.constant 1.250000e-01 : f32
    %11 = vector.broadcast %cst_7 : f32 to vector<1x256xf32>
    %12 = arith.mulf %7, %11 : vector<1x256xf32>
    %cst_8 = arith.constant 1.250000e-01 : f32
    %13 = vector.broadcast %cst_8 : f32 to vector<1x256xf32>
    %14 = arith.mulf %10, %13 : vector<1x256xf32>
    %15 = arith.mulf %12, %12 : vector<1x256xf32>
    %16 = arith.subf %14, %15 : vector<1x256xf32>
    %cst_9 = arith.constant 0.000000e+00 : f32
    %17 = vector.broadcast %cst_9 : f32 to vector<1x256xf32>
    %18 = arith.maximumf %16, %17 : vector<1x256xf32>
    %19 = vector.broadcast %12 : vector<1x256xf32> to vector<8x256xf32>
    %20 = arith.subf %5, %19 : vector<8x256xf32>
    %cst_10 = arith.constant 9.99999974E-6 : f32
    %21 = vector.broadcast %cst_10 : f32 to vector<1x256xf32>
    %22 = arith.addf %18, %21 : vector<1x256xf32>
    %23 = math.rsqrt %22 : vector<1x256xf32>
    %24 = vector.broadcast %23 : vector<1x256xf32> to vector<8x256xf32>
    %25 = arith.mulf %20, %24 : vector<8x256xf32>
    %cst_11 = arith.constant 0.000000e+00 : f32
    %26 = vector.broadcast %cst_11 : f32 to vector<8x256xf32>
    %27 = arith.cmpf ogt, %25, %26 : vector<8x256xf32>
    %cst_12 = arith.constant 2.000000e-01 : f32
    %28 = vector.broadcast %cst_12 : f32 to vector<8x256xf32>
    %29 = arith.mulf %28, %25 : vector<8x256xf32>
    %30 = arith.select %27, %25, %29 : vector<8x256xi1>, vector<8x256xf32>
    %31 = arith.truncf %30 : vector<8x256xf32> to vector<8x256xbf16>
    %c0_13 = arith.constant 0 : index
    %c0_14 = arith.constant 0 : index
    %32 = vector.load %arg3[%c0_13, %c0_14] : memref<8x256xbf16, #tpu.memory_space<vmem>>, vector<8x256xbf16>
    tpu.vector_store %arg3[%c0_13, %c0_14], %31 {strides = array<i32>} : memref<8x256xbf16, #tpu.memory_space<vmem>>, vector<8x256xbf16>,
    return
  }
}

module attributes {stable_mosaic.version = 11 : i64} {
  func.func @_conv_fused_kernel(%arg0: memref<8x2304xbf16, #tpu.memory_space<vmem>>, %arg1: memref<2304x128xbf16, #tpu.memory_space<vmem>>, %arg2: memref<1x128xf32, #tpu.memory_space<vmem>>, %arg3: memref<8x128xf32, #tpu.memory_space<vmem>>) attributes {dimension_semantics = [], scalar_prefetch = 0 : i64, scratch_operands = 0 : i64, tpu.core_type = #tpu.core_type<tc>} {
    %c0 = arith.constant 0 : index
    %c0_0 = arith.constant 0 : index
    %0 = vector.load %arg0[%c0, %c0_0] : memref<8x2304xbf16, #tpu.memory_space<vmem>>, vector<8x2304xbf16>
    %c0_1 = arith.constant 0 : index
    %c0_2 = arith.constant 0 : index
    %1 = vector.load %arg1[%c0_1, %c0_2] : memref<2304x128xbf16, #tpu.memory_space<vmem>>, vector<2304x128xbf16>
    %cst = arith.constant dense<0.000000e+00> : vector<8x128xf32>
    %2 = tpu.matmul %0, %1, %cst {dimension_numbers = #tpu.dot_dimension_numbers<[1], [0], [0], [1], [0, 0, 1, 1], [], []>} : vector<8x2304xbf16>, vector<2304x128xbf16>, vector<8x128xf32> -> vector<8x128xf32>
    %c0_3 = arith.constant 0 : index
    %c0_4 = arith.constant 0 : index
    %3 = vector.load %arg2[%c0_3, %c0_4] : memref<1x128xf32, #tpu.memory_space<vmem>>, vector<1x128xf32>
    %4 = vector.broadcast %3 : vector<1x128xf32> to vector<8x128xf32>
    %5 = arith.addf %2, %4 : vector<8x128xf32>
    %6 = arith.negf %5 : vector<8x128xf32>
    %7 = math.exp %6 : vector<8x128xf32>
    %cst_5 = arith.constant 1.000000e+00 : f32
    %8 = vector.broadcast %cst_5 : f32 to vector<8x128xf32>
    %9 = arith.addf %8, %7 : vector<8x128xf32>
    %10 = arith.divf %8, %9 : vector<8x128xf32>
    %c0_6 = arith.constant 0 : index
    %c0_7 = arith.constant 0 : index
    %11 = vector.load %arg3[%c0_6, %c0_7] : memref<8x128xf32, #tpu.memory_space<vmem>>, vector<8x128xf32>
    tpu.vector_store %arg3[%c0_6, %c0_7], %10 {strides = array<i32>} : memref<8x128xf32, #tpu.memory_space<vmem>>, vector<8x128xf32>,
    return
  }
}

</mosaic_0001>

<bundles_post_ra>
// kernel: discriminator_forward.4
= control target key start
LH: loop header
LB: loop body
LE: loop exit
PB: predicated region body
PF: predicated region fallthrough
CT: control target
= control target key end

     0   :  { %vm114_vm0 = vcmask 588800   ;;  %vm139_vm1 = vcmask 1043456   ;;  %vm352_vm2 = vcmask 519168   ;;  %s643_s1 = inlined_call_operand.vmem [shape: bf16[72,64], index: 1, kind: input, shape index: {}]   ;;  %s644_s0 = inlined_call_operand.vmem [shape: bf16[128,72], index: 0, kind: input, shape index: {}]   ;;  %s645_s2 = inlined_call_operand.vmem [shape: f32[1,64], index: 2, kind: input, shape index: {}]   ;;  %s646_s3 = inlined_call_operand.vmem [shape: bf16[128,64], index: 3, kind: output, shape index: {}]  }
   0x1   :  { %v478_v0 = vld [vmem:[%s643_s1] sm:$0xff]   ;;  %v479_v1 = vld [vmem:[%s643_s1 + $0x8] sm:$0xff]   ;;  %v480_v2 = vld [vmem:[%s643_s1 + $0x10] sm:$0xff]  }
   0x2   :  { %440 = vmatprep.subr.bf16.mxu0 %v478_v0  ;;  %466 = vmatprep.subr.bf16.mxu1 %v478_v0  ;;  %v483_v3 = vld [vmem:[%s644_s0] sm:$0xff]   ;;  %v481_v5 = vld [vmem:[%s643_s1 + $0x18] sm:$0xff]   ;;  %v485_v8 = vld [vmem:[%s644_s0 + $0x8] sm:$0xff]  }
   0x3   :  { %441 = vmatpush3.bf16.msra.mxu0 %v478_v0  ;;  %471 = vmatpush3.bf16.msra.mxu1 %v478_v0  ;;  %v484_v4 = vld [vmem:[%s644_s0 + $0x20] sm:$0xff]   ;;  %v486_v9 = vld [vmem:[%s644_s0 + $0x28] sm:$0xff]   ;;  %v487_v10 = vld [vmem:[%s644_s0 + $0x10] sm:$0xff]  }
   0x4   :  { %442 = vmatprep.subr.bf16.mxu0 %v479_v1  ;;  %467 = vmatprep.subr.bf16.mxu1 %v479_v1  ;;  %v482_v6 = vld [vmem:[%s643_s1 + $0x20] ss:$0 sps:$4 sm:$0xff]   ;;  %v488_v11 = vld [vmem:[%s644_s0 + $0x30] sm:$0xff]   ;;  %v489_v12 = vld [vmem:[%s644_s0 + $0x18] sm:$0xff]  }
   0x5   :  { %450 = vmatprep.mubr.msk.bf16.mxu0 %vm114_vm0, %v483_v3  ;;  %458 = vmatprep.mubr.msk.bf16.mxu1 %vm114_vm0, %v484_v4  ;;  %v141_v7 = vsel %vm139_vm1, %v482_v6, 0  ;;  %v490_v13 = vld [vmem:[%s644_s0 + $0x38] sm:$0xff]   ;;  %v561_v14 = vld [vmem:[%s645_s2] ss:$0 sm:$0xff] }
   0x7   :  { %443 = vmatpush3.bf16.msra.mxu0 %v479_v1  ;;  %472 = vmatpush3.bf16.msra.mxu1 %v479_v1 }
   0x8   :  { %444 = vmatprep.subr.bf16.mxu0 %v480_v2  ;;  %468 = vmatprep.subr.bf16.mxu1 %v480_v2 }
   0xb   :  { %445 = vmatpush3.bf16.msra.mxu0 %v480_v2  ;;  %473 = vmatpush3.bf16.msra.mxu1 %v480_v2 }
   0xc   :  { %446 = vmatprep.subr.bf16.mxu0 %v481_v5  ;;  %469 = vmatprep.subr.bf16.mxu1 %v481_v5 }
   0xf   :  { %447 = vmatpush3.bf16.msra.mxu0 %v481_v5  ;;  %474 = vmatpush3.bf16.msra.mxu1 %v481_v5 }
  0x10   :  { %476 = vmatprep.subr.msk.bf16.mxu0 %vm139_vm1, %v482_v6  ;;  %477 = vmatprep.subr.msk.bf16.mxu1 %vm139_vm1, %v482_v6 }
  0x13   :  { %449 = vmatpush3.bf16.msra.mxu0 %v141_v7  ;;  %475 = vmatpush3.bf16.msra.mxu1 %v141_v7 }
  0x16   :  { %451 = vmatmul.mubr.msk.bf16.vlgmr.msra.gmra.mrb[0].mxu0 %vm114_vm0, %v485_v8  ;;  %459 = vmatmul.mubr.msk.bf16.vlgmr.msra.gmra.mrb[0].mxu1 %vm114_vm0, %v486_v9 }
  0x17   :  { %454 = vmatprep.mubr.msk.bf16.mxu0 %vm114_vm0, %v487_v10  ;;  %462 = vmatprep.mubr.msk.bf16.mxu1 %vm114_vm0, %v488_v11 }
  0x1e   :  { %455 = vmatmul.mubr.msk.bf16.gmra.mrb[4].mxu0 %vm114_vm0, %v489_v12  ;;  %463 = vmatmul.mubr.msk.bf16.gmra.mrb[4].mxu1 %vm114_vm0, %v490_v13 }
  0xe9   :  { %v452_v15 = vpop.f32.mrb[0].mxu0  ;;  %v460_v16 = vpop.f32.mrb[0].mxu1 }
  0xea   :  { %v186_v17 = vadd.f32 %v452_v15, %v561_v14  ;;  %v218_v18 = vadd.f32 %v460_v16, %v561_v14  ;;  %v177_v19 = vpop.f32.mrb[1].mxu0  ;;  %v209_v20 = vpop.f32.mrb[1].mxu1 }
  0xeb   :  { %v178_v21 = vadd.f32 %v561_v14, %v177_v19  ;;  %v210_v22 = vadd.f32 %v561_v14, %v209_v20  ;;  %v453_v23 = vpop.f32.mrb[2].mxu0  ;;  %v461_v24 = vpop.f32.mrb[2].mxu1 }
  0xec   :  { %vm242_vm3 = vcmp.gt.f32.partialorder %v186_v17, 0.0  ;;  %v258_v25 = vmul.f32 0.2, %v186_v17  ;;  %vm250_vm4 = vcmp.gt.f32.partialorder %v218_v18, 0.0  ;;  %v266_v26 = vmul.f32 0.2, %v218_v18 }
  0xed   :  { %vm240_vm5 = vcmp.gt.f32.partialorder %v178_v21, 0.0  ;;  %v256_v27 = vmul.f32 0.2, %v178_v21  ;;  %vm248_vm6 = vcmp.gt.f32.partialorder %v210_v22, 0.0  ;;  %v264_v28 = vmul.f32 0.2, %v210_v22 }
  0xee   :  { %v274_v29 = vsel %vm242_vm3, %v186_v17, %v258_v25  ;;  %v282_v30 = vsel %vm250_vm4, %v218_v18, %v266_v26  ;;  %v189_v31 = vadd.f32 %v453_v23, %v561_v14  ;;  %v221_v32 = vadd.f32 %v461_v24, %v561_v14  ;;  %v180_v33 = vpop.f32.mrb[3].mxu0  ;;  %v212_v34 = vpop.f32.mrb[3].mxu1 }
  0xef   :  { %v413_v35 = vpack.c.bf16 %v274_v29, %v274_v29  ;;  %v421_v36 = vpack.c.bf16 %v282_v30, %v282_v30  ;;  %v272_v37 = vsel %vm240_vm5, %v178_v21, %v256_v27  ;;  %v280_v38 = vsel %vm248_vm6, %v210_v22, %v264_v28 }
  0xf0   :  { %v411_v39 = vpack.c.bf16 %v272_v37, %v272_v37  ;;  %v419_v40 = vpack.c.bf16 %v280_v38, %v280_v38  ;;  %vm243_vm7 = vcmp.gt.f32.partialorder %v189_v31, 0.0  ;;  %v259_v41 = vmul.f32 0.2, %v189_v31 }
  0xf1   :  { %355 = vst.msk [vmem:[%s646_s3 + $0x8] sm:$0xf] %vm352_vm2, %v413_v35  ;;  %363 = vst.msk [vmem:[%s646_s3 + $0x28] sm:$0xf] %vm352_vm2, %v421_v36  ;;  %vm251_vm8 = vcmp.gt.f32.partialorder %v221_v32, 0.0  ;;  %v181_v43 = vadd.f32 %v561_v14, %v180_v33  ;;  %v213_v44 = vadd.f32 %v561_v14, %v212_v34  ;;  %v456_v45 = vpop.f32.mrb[4].mxu0 }
  0xf2   :  { %v267_v42 = vmul.f32 0.2, %v221_v32  ;;  %v464_v46 = vpop.f32.mrb[4].mxu1  ;;  %353 = vst.msk [vmem:[%s646_s3] sm:$0xf] %vm352_vm2, %v411_v39  ;;  %v275_v47 = vsel %vm243_vm7, %v189_v31, %v259_v41  ;;  %v202_v48 = vadd.f32 %v456_v45, %v561_v14  ;;  %v193_v50 = vpop.f32.mrb[5].mxu0 }
  0xf3   :  { %361 = vst.msk [vmem:[%s646_s3 + $0x20] sm:$0xf] %vm352_vm2, %v419_v40  ;;  %v234_v49 = vadd.f32 %v464_v46, %v561_v14  ;;  %v225_v51 = vpop.f32.mrb[5].mxu1  ;;  %v414_v52 = vpack.c.bf16 %v275_v47, %v275_v47  ;;  %vm241_vm9 = vcmp.gt.f32.partialorder %v181_v43, 0.0  ;;  %v257_v54 = vmul.f32 0.2, %v181_v43 }
  0xf4   :  { %v283_v53 = vsel %vm251_vm8, %v221_v32, %v267_v42  ;;  %v457_v55 = vpop.f32.mrb[6].mxu0  ;;  %v465_v56 = vpop.f32.mrb[6].mxu1  ;;  %vm249_vm10 = vcmp.gt.f32.partialorder %v213_v44, 0.0  ;;  %v265_v58 = vmul.f32 0.2, %v213_v44  ;;  %vm246_vm11 = vcmp.gt.f32.partialorder %v202_v48, 0.0 }
  0xf5   :  { %v422_v57 = vpack.c.bf16 %v283_v53, %v283_v53  ;;  %v196_v59 = vpop.f32.mrb[7].mxu0  ;;  %v228_v60 = vpop.f32.mrb[7].mxu1  ;;  %356 = vst.msk [vmem:[%s646_s3 + $0xc] sm:$0xf] %vm352_vm2, %v414_v52  ;;  %v273_v61 = vsel %vm241_vm9, %v181_v43, %v257_v54  ;;  %v262_v62 = vmul.f32 0.2, %v202_v48  ;;  %v194_v2 = vadd.f32 %v561_v14, %v193_v50 }
  0xf6   :  { %vm254_vm12 = vcmp.gt.f32.partialorder %v234_v49, 0.0  ;;  %v270_v63 = vmul.f32 0.2, %v234_v49  ;;  %v412_v0 = vpack.c.bf16 %v273_v61, %v273_v61  ;;  %v281_v1 = vsel %vm249_vm10, %v213_v44, %v265_v58 }
  0xf7   :  { %364 = vst.msk [vmem:[%s646_s3 + $0x2c] sm:$0xf] %vm352_vm2, %v422_v57  ;;  %v226_v3 = vadd.f32 %v561_v14, %v225_v51  ;;  %v420_v4 = vpack.c.bf16 %v281_v1, %v281_v1  ;;  %v278_v5 = vsel %vm246_vm11, %v202_v48, %v262_v62  ;;  %v205_v7 = vadd.f32 %v457_v55, %v561_v14 }
  0xf8   :  { %v286_v6 = vsel %vm254_vm12, %v234_v49, %v270_v63  ;;  %354 = vst.msk [vmem:[%s646_s3 + $0x4] sm:$0xf] %vm352_vm2, %v412_v0  ;;  %v417_v8 = vpack.c.bf16 %v278_v5, %v278_v5  ;;  %vm244_vm13 = vcmp.gt.f32.partialorder %v194_v2, 0.0  ;;  %v260_v10 = vmul.f32 0.2, %v194_v2 }
  0xf9   :  { %v425_v9 = vpack.c.bf16 %v286_v6, %v286_v6  ;;  %362 = vst.msk [vmem:[%s646_s3 + $0x24] sm:$0xf] %vm352_vm2, %v420_v4  ;;  %vm252_vm14 = vcmp.gt.f32.partialorder %v226_v3, 0.0  ;;  %v268_v11 = vmul.f32 0.2, %v226_v3  ;;  %vm247_vm15 = vcmp.gt.f32.partialorder %v205_v7, 0.0 }
  0xfa   :  { %v263_v12 = vmul.f32 0.2, %v205_v7  ;;  %359 = vst.msk [vmem:[%s646_s3 + $0x18] sm:$0xf] %vm352_vm2, %v417_v8  ;;  %v276_v13 = vsel %vm244_vm13, %v194_v2, %v260_v10  ;;  %v237_v15 = vadd.f32 %v465_v56, %v561_v14  ;;  %v197_v16 = vadd.f32 %v561_v14, %v196_v59 }
  0xfb   :  { %367 = vst.msk [vmem:[%s646_s3 + $0x38] sm:$0xf] %vm352_vm2, %v425_v9  ;;  %v229_v17 = vadd.f32 %v561_v14, %v228_v60  ;;  %v415_v18 = vpack.c.bf16 %v276_v13, %v276_v13  ;;  %v284_v19 = vsel %vm252_vm14, %v226_v3, %v268_v11 }
  0xfc   :  { %v279_v20 = vsel %vm247_vm15, %v205_v7, %v263_v12  ;;  %v423_v21 = vpack.c.bf16 %v284_v19, %v284_v19  ;;  %vm255_vm0 = vcmp.gt.f32.partialorder %v237_v15, 0.0  ;;  %v271_v23 = vmul.f32 0.2, %v237_v15 }
  0xfd   :  { %v418_v22 = vpack.c.bf16 %v279_v20, %v279_v20  ;;  %357 = vst.msk [vmem:[%s646_s3 + $0x10] sm:$0xf] %vm352_vm2, %v415_v18  ;;  %vm245_vm1 = vcmp.gt.f32.partialorder %v197_v16, 0.0  ;;  %v261_v24 = vmul.f32 0.2, %v197_v16  ;;  %vm253_vm3 = vcmp.gt.f32.partialorder %v229_v17, 0.0 }
  0xfe   :  { %v269_v25 = vmul.f32 0.2, %v229_v17  ;;  %365 = vst.msk [vmem:[%s646_s3 + $0x30] sm:$0xf] %vm352_vm2, %v423_v21  ;;  %v287_v14 = vsel %vm255_vm0, %v237_v15, %v271_v23 }
  0xff   :  { %360 = vst.msk [vmem:[%s646_s3 + $0x1c] sm:$0xf] %vm352_vm2, %v418_v22  ;;  %v426_v26 = vpack.c.bf16 %v287_v14, %v287_v14  ;;  %v277_v27 = vsel %vm245_vm1, %v197_v16, %v261_v24 }
 0x100   :  { %v285_v28 = vsel %vm253_vm3, %v229_v17, %v269_v25  ;;  %v416_v29 = vpack.c.bf16 %v277_v27, %v277_v27 }
 0x101   :  { %v424_v30 = vpack.c.bf16 %v285_v28, %v285_v28  ;;  %368 = vst.msk [vmem:[%s646_s3 + $0x3c] sm:$0xf] %vm352_vm2, %v426_v26 }
 0x102   :  { %358 = vst.msk [vmem:[%s646_s3 + $0x14] sm:$0xf] %vm352_vm2, %v416_v29 }
 0x103   :  { %366 = vst.msk [vmem:[%s646_s3 + $0x34] sm:$0xf] %vm352_vm2, %v424_v30 }

// kernel: discriminator_forward.5
= control target key start
LH: loop header
LB: loop body
LE: loop exit
PB: predicated region body
PF: predicated region fallthrough
CT: control target
= control target key end

     0   :  { %vm372_vm0 = vcmask 523264   ;;  %s960_s1 = inlined_call_operand.vmem [shape: bf16[576,128], index: 1, kind: input, shape index: {}]   ;;  %s961_s0 = inlined_call_operand.vmem [shape: bf16[32,576], index: 0, kind: input, shape index: {}]   ;;  %s962_s2 = inlined_call_operand.vmem [shape: f32[1,128], index: 2, kind: input, shape index: {}]   ;;  %s963_s3 = inlined_call_operand.vmem [shape: bf16[32,128], index: 3, kind: output, shape index: {}]  }
   0x1   :  { %v741_v0 = vld [vmem:[%s960_s1 + $0x40] sm:$0xff]   ;;  %v745_v4 = vld [vmem:[%s960_s1 + $0x48] sm:$0xff]   ;;  %v749_v8 = vld [vmem:[%s960_s1 + $0x50] sm:$0xff]  }
   0x2   :  { %v742_v1 = vld [vmem:[%s960_s1] sm:$0xff]   ;;  %667 = vmatprep.subr.bf16.mxu0 %v741_v0  ;;  %v746_v5 = vld [vmem:[%s960_s1 + $0x8] sm:$0xff]   ;;  %v750_v9 = vld [vmem:[%s960_s1 + $0x10] sm:$0xff]  }
   0x3   :  { %v743_v2 = vld [vmem:[%s960_s1 + $0xc0] sm:$0xff]   ;;  %668 = vmatpush3.bf16.msra.mxu0 %v742_v1  ;;  %v747_v6 = vld [vmem:[%s960_s1 + $0xc8] sm:$0xff]   ;;  %v751_v10 = vld [vmem:[%s960_s1 + $0xd0] sm:$0xff]  }
   0x4   :  { %v744_v3 = vld [vmem:[%s960_s1 + $0x80] sm:$0xff]   ;;  %695 = vmatprep.subr.bf16.mxu1 %v743_v2  ;;  %669 = vmatprep.subr.bf16.mxu0 %v745_v4  ;;  %v748_v7 = vld [vmem:[%s960_s1 + $0x88] sm:$0xff]   ;;  %v752_v11 = vld [vmem:[%s960_s1 + $0x90] sm:$0xff]  }
   0x5   :  { %696 = vmatpush3.bf16.msra.mxu1 %v744_v3  ;;  %v753_v12 = vld [vmem:[%s960_s1 + $0x58] sm:$0xff]   ;;  %v757_v16 = vld [vmem:[%s960_s1 + $0x60] sm:$0xff]   ;;  %v761_v20 = vld [vmem:[%s960_s1 + $0x68] sm:$0xff]  }
   0x6   :  { %697 = vmatprep.subr.bf16.mxu1 %v747_v6  ;;  %v754_v13 = vld [vmem:[%s960_s1 + $0x18] sm:$0xff]   ;;  %v758_v17 = vld [vmem:[%s960_s1 + $0x20] sm:$0xff]   ;;  %v762_v21 = vld [vmem:[%s960_s1 + $0x28] sm:$0xff]  }
   0x7   :  { %670 = vmatpush3.bf16.msra.mxu0 %v746_v5  ;;  %v755_v14 = vld [vmem:[%s960_s1 + $0xd8] sm:$0xff]   ;;  %v759_v18 = vld [vmem:[%s960_s1 + $0xe0] sm:$0xff]   ;;  %v763_v22 = vld [vmem:[%s960_s1 + $0xe8] sm:$0xff]  }
   0x8   :  { %671 = vmatprep.subr.bf16.mxu0 %v749_v8  ;;  %v756_v15 = vld [vmem:[%s960_s1 + $0x98] sm:$0xff]   ;;  %v760_v19 = vld [vmem:[%s960_s1 + $0xa0] sm:$0xff]   ;;  %v764_v23 = vld [vmem:[%s960_s1 + $0xa8] sm:$0xff]  }
   0x9   :  { %698 = vmatpush3.bf16.msra.mxu1 %v748_v7  ;;  %v765_v24 = vld [vmem:[%s960_s1 + $0x70] sm:$0xff]   ;;  %v769_v28 = vld [vmem:[%s960_s1 + $0x78] sm:$0xff]   ;;  %v776_v34 = vld [vmem:[%s960_s1 + $0x100] sm:$0xff]  }
   0xa   :  { %699 = vmatprep.subr.bf16.mxu1 %v751_v10  ;;  %v766_v25 = vld [vmem:[%s960_s1 + $0x30] sm:$0xff]   ;;  %v770_v29 = vld [vmem:[%s960_s1 + $0x38] sm:$0xff]   ;;  %v779_v36 = vld [vmem:[%s961_s0 + $0xc] ss:$20 sps:$4 sm:$0xff]  }
   0xb   :  { %672 = vmatpush3.bf16.msra.mxu0 %v750_v9  ;;  %v767_v26 = vld [vmem:[%s960_s1 + $0xf0] sm:$0xff]   ;;  %v771_v30 = vld [vmem:[%s960_s1 + $0xf8] sm:$0xff]   ;;  %v780_v37 = vld [vmem:[%s960_s1 + $0x108] sm:$0xff]   ;;  %460 = vmatprep.mubr.bf16.mxu1 %v779_v36 }
   0xc   :  { %673 = vmatprep.subr.bf16.mxu0 %v753_v12  ;;  %v768_v27 = vld [vmem:[%s960_s1 + $0xb0] sm:$0xff]   ;;  %v774_v32 = vld [vmem:[%s961_s0 + $0x4] ss:$20 sps:$4 sm:$0xff]   ;;  %v777_v35 = vld [vmem:[%s961_s0 + $0x8] ss:$20 sps:$4 sm:$0xff]  }
   0xd   :  { %700 = vmatpush3.bf16.msra.mxu1 %v752_v11  ;;  %v772_v31 = vld [vmem:[%s961_s0] ss:$20 sps:$4 sm:$0xff]   ;;  %v775_v33 = vld [vmem:[%s960_s1 + $0xb8] sm:$0xff]   ;;  %411 = vmatprep.mubr.bf16.mxu0 %v774_v32  ;;  %v787_v42 = vld [vmem:[%s961_s0 + $0x30] ss:$20 sps:$4 sm:$0xff]  }
   0xe   :  { %701 = vmatprep.subr.bf16.mxu1 %v755_v14  ;;  %v781_v38 = vld [vmem:[%s961_s0 + $0x2c] ss:$20 sps:$4 sm:$0xff]   ;;  %v783_v39 = vld [vmem:[%s961_s0 + $0x28] ss:$20 sps:$4 sm:$0xff]   ;;  %v784_v40 = vld [vmem:[%s960_s1 + $0x110] sm:$0xff]  }
   0xf   :  { %674 = vmatpush3.bf16.msra.mxu0 %v754_v13  ;;  %v785_v41 = vld [vmem:[%s961_s0 + $0x34] ss:$20 sps:$4 sm:$0xff]   ;;  %v788_v43 = vld [vmem:[%s960_s1 + $0x118] sm:$0xff]   ;;  %v789_v44 = vld [vmem:[%s961_s0 + $0x10] ss:$20 sps:$4 sm:$0xff]  }
  0x10   :  { %675 = vmatprep.subr.bf16.mxu0 %v757_v16  ;;  %v790_v45 = vld [vmem:[%s961_s0 + $0x38] ss:$20 sps:$4 sm:$0xff]   ;;  %v599_v47 = vld [vmem:[%s962_s2] ss:$0 sm:$0xff] }
  0x11   :  { %702 = vmatpush3.bf16.msra.mxu1 %v756_v15 }
  0x12   :  { %703 = vmatprep.subr.bf16.mxu1 %v759_v18 }
  0x13   :  { %676 = vmatpush3.bf16.msra.mxu0 %v758_v17 }
  0x14   :  { %677 = vmatprep.subr.bf16.mxu0 %v761_v20 }
  0x15   :  { %704 = vmatpush3.bf16.msra.mxu1 %v760_v19 }
  0x16   :  { %705 = vmatprep.subr.bf16.mxu1 %v763_v22 }
  0x17   :  { %678 = vmatpush3.bf16.msra.mxu0 %v762_v21 }
  0x18   :  { %679 = vmatprep.subr.bf16.mxu0 %v765_v24 }
  0x19   :  { %706 = vmatpush3.bf16.msra.mxu1 %v764_v23 }
  0x1a   :  { %707 = vmatprep.subr.bf16.mxu1 %v767_v26 }
  0x1b   :  { %680 = vmatpush3.bf16.msra.mxu0 %v766_v25 }
  0x1c   :  { %681 = vmatprep.subr.bf16.mxu0 %v769_v28 }
  0x1d   :  { %708 = vmatpush3.bf16.msra.mxu1 %v768_v27 }
  0x1e   :  { %709 = vmatprep.subr.bf16.mxu1 %v771_v30 }
  0x1f   :  { %682 = vmatpush3.bf16.msra.mxu0 %v770_v29 }
  0x20   :  { %729 = vmatprep.subr.bf16.mxu0 %v776_v34 }
  0x21   :  { %710 = vmatpush3.bf16.msra.mxu1 %v775_v33 }
  0x22   :  { %412 = vmatmul.mubr.bf16.vlgmr.msra.gmra.mrb[0].mxu0 %v772_v31 }
  0x23   :  { %730 = vmatpush3.bf16.msra.mxu0 %v776_v34  ;;  %419 = vmatprep.mubr.bf16.mxu0 %v781_v38 }
  0x24   :  { %461 = vmatmul.mubr.bf16.vlgmr.msra.gmra.mrb[0].mxu1 %v777_v35  ;;  %731 = vmatprep.subr.bf16.mxu0 %v780_v37 }
  0x25   :  { %468 = vmatprep.mubr.bf16.mxu1 %v785_v41 }
  0x27   :  { %732 = vmatpush3.bf16.msra.mxu0 %v780_v37 }
  0x28   :  { %733 = vmatprep.subr.bf16.mxu0 %v784_v40 }
  0x2a   :  { %420 = vmatmul.mubr.bf16.gmra.mrb[4].mxu0 %v783_v39 }
  0x2b   :  { %737 = vmatprep.mubr.msk.bf16.mxu0 %vm372_vm0, %v789_v44  ;;  %734 = vmatpush3.bf16.msra.mxu0 %v784_v40 }
  0x2c   :  { %469 = vmatmul.mubr.bf16.gmra.mrb[4].mxu1 %v787_v42  ;;  %735 = vmatprep.subr.bf16.mxu0 %v788_v43 }
  0x2f   :  { %736 = vmatpush3.bf16.msra.mxu0 %v788_v43 }
  0x32   :  { %738 = vmatmul.mubr.msk.bf16.vlgmr.msra.gmra.mrb[8].mxu0 %vm372_vm0, %v790_v45 }
  0xf5   :  { %v683_v46 = vpop.f32.mrb[0].mxu0 }
  0xf6   :  { %v684_v48 = vpop.f32.mrb[1].mxu0 }
  0xf7   :  { %v685_v49 = vadd.f32 %v684_v48, %v683_v46  ;;  %v686_v50 = vpop.f32.mrb[2].mxu0  ;;  %v711_v51 = vpop.f32.mrb[0].mxu1 }
  0xf8   :  { %v687_v52 = vpop.f32.mrb[3].mxu0  ;;  %v712_v55 = vpop.f32.mrb[1].mxu1 }
  0xf9   :  { %v414_v53 = vadd.f32 %v685_v49, %v599_v47  ;;  %v688_v54 = vadd.f32 %v687_v52, %v686_v50  ;;  %v713_v56 = vadd.f32 %v712_v55, %v711_v51  ;;  %v714_v57 = vpop.f32.mrb[2].mxu1 }
  0xfa   :  { %v715_v59 = vpop.f32.mrb[3].mxu1 }
  0xfb   :  { %v417_v58 = vadd.f32 %v688_v54, %v599_v47  ;;  %v716_v60 = vadd.f32 %v715_v59, %v714_v57  ;;  %v463_v61 = vadd.f32 %v713_v56, %v414_v53 }
  0xfd   :  { %v689_v62 = vpop.f32.mrb[4].mxu0  ;;  %v466_v0 = vadd.f32 %v716_v60, %v417_v58 }
  0xfe   :  { %v690_v63 = vpop.f32.mrb[5].mxu0 }
  0xff   :  { %v691_v1 = vadd.f32 %v690_v63, %v689_v62  ;;  %v692_v2 = vpop.f32.mrb[6].mxu0  ;;  %v717_v3 = vpop.f32.mrb[4].mxu1 }
 0x100   :  { %v693_v4 = vpop.f32.mrb[7].mxu0  ;;  %v718_v7 = vpop.f32.mrb[5].mxu1 }
 0x101   :  { %v422_v5 = vadd.f32 %v691_v1, %v599_v47  ;;  %v694_v6 = vadd.f32 %v693_v4, %v692_v2  ;;  %v719_v8 = vadd.f32 %v718_v7, %v717_v3  ;;  %v720_v9 = vpop.f32.mrb[6].mxu1 }
 0x102   :  { %v721_v11 = vpop.f32.mrb[7].mxu1 }
 0x103   :  { %v425_v10 = vadd.f32 %v694_v6, %v599_v47  ;;  %v722_v12 = vadd.f32 %v721_v11, %v720_v9  ;;  %v471_v13 = vadd.f32 %v719_v8, %v422_v5 }
 0x105   :  { %v739_v14 = vpop.f32.mrb[8].mxu0  ;;  %v474_v15 = vadd.f32 %v722_v12, %v425_v10 }
 0x106   :  { %v520_v16 = vadd.f32 %v739_v14, %v471_v13  ;;  %v511_v17 = vpop.f32.mrb[9].mxu0 }
 0x107   :  { %v512_v18 = vadd.f32 %v511_v17, %v463_v61  ;;  %v740_v19 = vpop.f32.mrb[10].mxu0 }
 0x108   :  { %v523_v20 = vadd.f32 %v740_v19, %v474_v15  ;;  %v514_v21 = vpop.f32.mrb[11].mxu0  ;;  %v537_v26 = vmul.f32 %v520_v16, %v520_v16 }
 0x109   :  { %v515_v22 = vadd.f32 %v514_v21, %v466_v0  ;;  %v535_v23 = vmul.f32 %v512_v18, %v512_v18 }
 0x10a   :  { %v538_v29 = vmul.f32 %v523_v20, %v523_v20 }
 0x10b   :  { %v526_v24 = vadd.f32 %v515_v22, %v512_v18  ;;  %v536_v25 = vmul.f32 %v515_v22, %v515_v22 }
 0x10d   :  { %v527_v27 = vadd.f32 %v526_v24, %v520_v16  ;;  %v539_v28 = vadd.f32 %v536_v25, %v535_v23 }
 0x10f   :  { %v528_v30 = vadd.f32 %v527_v27, %v523_v20  ;;  %v540_v31 = vadd.f32 %v539_v28, %v537_v26 }
 0x111   :  { %v529_v32 = vrot.slane %v528_v30, 4  ;;  %v541_v33 = vadd.f32 %v540_v31, %v538_v29 }
 0x113   :  { %v530_v34 = vadd.f32 %v529_v32, %v528_v30  ;;  %v542_v35 = vrot.slane %v541_v33, 4 }
 0x115   :  { %v531_v36 = vrot.slane %v530_v34, 2  ;;  %v543_v37 = vadd.f32 %v542_v35, %v541_v33 }
 0x117   :  { %v532_v38 = vadd.f32 %v531_v36, %v530_v34  ;;  %v544_v39 = vrot.slane %v543_v37, 2 }
 0x119   :  { %v533_v40 = vrot.slane %v532_v38, 1  ;;  %v545_v41 = vadd.f32 %v544_v39, %v543_v37 }
 0x11b   :  { %v534_v42 = vadd.f32 %v533_v40, %v532_v38  ;;  %v546_v43 = vrot.slane %v545_v41, 1 }
 0x11d   :  { %v547_v44 = vadd.f32 %v546_v43, %v545_v41  ;;  %v548_v45 = vmul.f32 0.03125, %v534_v42 }
 0x11f   :  { %v549_v46 = vmul.f32 0.03125, %v547_v44  ;;  %v550_v47 = vmul.f32 %v548_v45, %v548_v45  ;;  %v553_v48 = vsub.f32 %v512_v18, %v548_v45  ;;  %v554_v49 = vsub.f32 %v515_v22, %v548_v45 }
 0x120   :  { %v555_v50 = vsub.f32 %v520_v16, %v548_v45  ;;  %v556_v51 = vsub.f32 %v523_v20, %v548_v45 }
 0x121   :  { %v551_v52 = vsub.f32 %v549_v46, %v550_v47 }
 0x123   :  { %v552_v53 = vmax.f32 %v551_v52, 0.0 }
 0x125   :  { %v557_v54 = vadd.f32 1e-05, %v552_v53 }
 0x127   :  { %791 = vrsqrt.f32 %v557_v54 }
 0x131   :  { %v792_v55 = vpop.eup %791 }
 0x132   :  { %v559_v56 = vmul.f32 %v792_v55, %v553_v48  ;;  %v560_v57 = vmul.f32 %v792_v55, %v554_v49  ;;  %v561_v58 = vmul.f32 %v792_v55, %v555_v50  ;;  %v562_v59 = vmul.f32 %v792_v55, %v556_v51 }
 0x134   :  { %vm563_vm1 = vcmp.gt.f32.partialorder %v559_v56, 0.0  ;;  %vm564_vm2 = vcmp.gt.f32.partialorder %v560_v57, 0.0  ;;  %vm565_vm3 = vcmp.gt.f32.partialorder %v561_v58, 0.0  ;;  %vm566_vm4 = vcmp.gt.f32.partialorder %v562_v59, 0.0 }
 0x135   :  { %v567_v60 = vmul.f32 0.2, %v559_v56  ;;  %v568_v61 = vmul.f32 0.2, %v560_v57  ;;  %v569_v62 = vmul.f32 0.2, %v561_v58 }
 0x136   :  { %v570_v63 = vmul.f32 0.2, %v562_v59 }
 0x137   :  { %v571_v0 = vsel %vm563_vm1, %v559_v56, %v567_v60  ;;  %v572_v1 = vsel %vm564_vm2, %v560_v57, %v568_v61  ;;  %v573_v2 = vsel %vm565_vm3, %v561_v58, %v569_v62 }
 0x138   :  { %v574_v3 = vsel %vm566_vm4, %v562_v59, %v570_v63  ;;  %v659_v4 = vpack.c.bf16 %v572_v1, %v571_v0 }
 0x139   :  { %v664_v5 = vpack.c.bf16 %v574_v3, %v573_v2 }
 0x13a   :  { %660 = vst [vmem:[%s963_s3] sm:$0xff] %v659_v4  }
 0x13b   :  { %666 = vst [vmem:[%s963_s3 + $0x8] sm:$0xff] %v664_v5  }

// kernel: discriminator_forward.6
= control target key start
LH: loop header
LB: loop body
LE: loop exit
PB: predicated region body
PF: predicated region fallthrough
CT: control target
= control target key end

     0   :  { %s2083_s1 = inlined_call_operand.vmem [shape: bf16[1152,256], index: 1, kind: input, shape index: {}]   ;;  %s2084_s0 = inlined_call_operand.vmem [shape: bf16[8,1152], index: 0, kind: input, shape index: {}]   ;;  %s2085_s2 = inlined_call_operand.vmem [shape: f32[1,256], index: 2, kind: input, shape index: {}]   ;;  %s2086_s3 = inlined_call_operand.vmem [shape: bf16[8,256], index: 3, kind: output, shape index: {}]  }
   0x1   :  { %v1368_v0 = vld [vmem:[%s2083_s1 + $0x4] ss:$8 sps:$4 sm:$0xff]   ;;  %v1372_v2 = vld [vmem:[%s2083_s1] ss:$8 sps:$4 sm:$0xff]   ;;  %v1374_v4 = vld [vmem:[%s2083_s1 + $0x14] ss:$8 sps:$4 sm:$0xff]  }
   0x2   :  { %v1370_v1 = vld [vmem:[%s2083_s1 + $0x204] ss:$8 sps:$4 sm:$0xff]   ;;  %928 = vmatprep.subr.bf16.mxu1 %v1368_v0  ;;  %v1373_v3 = vld [vmem:[%s2083_s1 + $0x200] ss:$8 sps:$4 sm:$0xff]   ;;  %v1376_v5 = vld [vmem:[%s2083_s1 + $0x214] ss:$8 sps:$4 sm:$0xff]  }
   0x3   :  { %1010 = vmatprep.subr.bf16.mxu0 %v1370_v1  ;;  %929 = vmatpush1.bf16.msra.mxu1 %v1372_v2  ;;  %v1378_v6 = vld [vmem:[%s2083_s1 + $0x10] ss:$8 sps:$4 sm:$0xff]   ;;  %v1380_v8 = vld [vmem:[%s2083_s1 + $0x24] ss:$8 sps:$4 sm:$0xff]   ;;  %v1384_v10 = vld [vmem:[%s2083_s1 + $0x20] ss:$8 sps:$4 sm:$0xff]  }
   0x4   :  { %1011 = vmatpush1.bf16.msra.mxu0 %v1373_v3  ;;  %930 = vmatprep.subr.bf16.mxu1 %v1374_v4  ;;  %v1379_v7 = vld [vmem:[%s2083_s1 + $0x210] ss:$8 sps:$4 sm:$0xff]   ;;  %v1382_v9 = vld [vmem:[%s2083_s1 + $0x224] ss:$8 sps:$4 sm:$0xff]   ;;  %v1385_v11 = vld [vmem:[%s2083_s1 + $0x220] ss:$8 sps:$4 sm:$0xff]  }
   0x5   :  { %1012 = vmatprep.subr.bf16.mxu0 %v1376_v5  ;;  %v1386_v12 = vld [vmem:[%s2083_s1 + $0x34] ss:$8 sps:$4 sm:$0xff]   ;;  %v1390_v14 = vld [vmem:[%s2083_s1 + $0x30] ss:$8 sps:$4 sm:$0xff]   ;;  %v1392_v16 = vld [vmem:[%s2083_s1 + $0x44] ss:$8 sps:$4 sm:$0xff]  }
   0x6   :  { %v1388_v13 = vld [vmem:[%s2083_s1 + $0x234] ss:$8 sps:$4 sm:$0xff]   ;;  %v1391_v15 = vld [vmem:[%s2083_s1 + $0x230] ss:$8 sps:$4 sm:$0xff]   ;;  %v1394_v17 = vld [vmem:[%s2083_s1 + $0x244] ss:$8 sps:$4 sm:$0xff]  }
   0x7   :  { %931 = vmatpush1.bf16.msra.mxu1 %v1378_v6  ;;  %v1396_v18 = vld [vmem:[%s2083_s1 + $0x40] ss:$8 sps:$4 sm:$0xff]   ;;  %v1398_v20 = vld [vmem:[%s2083_s1 + $0x54] ss:$8 sps:$4 sm:$0xff]   ;;  %v1402_v22 = vld [vmem:[%s2083_s1 + $0x50] ss:$8 sps:$4 sm:$0xff]  }
   0x8   :  { %1013 = vmatpush1.bf16.msra.mxu0 %v1379_v7  ;;  %932 = vmatprep.subr.bf16.mxu1 %v1380_v8  ;;  %v1397_v19 = vld [vmem:[%s2083_s1 + $0x240] ss:$8 sps:$4 sm:$0xff]   ;;  %v1400_v21 = vld [vmem:[%s2083_s1 + $0x254] ss:$8 sps:$4 sm:$0xff]   ;;  %v1403_v23 = vld [vmem:[%s2083_s1 + $0x250] ss:$8 sps:$4 sm:$0xff]  }
   0x9   :  { %1014 = vmatprep.subr.bf16.mxu0 %v1382_v9  ;;  %v1404_v24 = vld [vmem:[%s2083_s1 + $0x64] ss:$8 sps:$4 sm:$0xff]   ;;  %v1408_v26 = vld [vmem:[%s2083_s1 + $0x60] ss:$8 sps:$4 sm:$0xff]   ;;  %v1410_v28 = vld [vmem:[%s2083_s1 + $0x74] ss:$8 sps:$4 sm:$0xff]  }
   0xa   :  { %v1406_v25 = vld [vmem:[%s2083_s1 + $0x264] ss:$8 sps:$4 sm:$0xff]   ;;  %v1409_v27 = vld [vmem:[%s2083_s1 + $0x260] ss:$8 sps:$4 sm:$0xff]   ;;  %v1412_v29 = vld [vmem:[%s2083_s1 + $0x274] ss:$8 sps:$4 sm:$0xff]  }
   0xb   :  { %933 = vmatpush1.bf16.msra.mxu1 %v1384_v10  ;;  %v1414_v30 = vld [vmem:[%s2083_s1 + $0x70] ss:$8 sps:$4 sm:$0xff]   ;;  %v1416_v32 = vld [vmem:[%s2083_s1 + $0x84] ss:$8 sps:$4 sm:$0xff]   ;;  %v1420_v34 = vld [vmem:[%s2083_s1 + $0x80] ss:$8 sps:$4 sm:$0xff]  }
   0xc   :  { %1015 = vmatpush1.bf16.msra.mxu0 %v1385_v11  ;;  %934 = vmatprep.subr.bf16.mxu1 %v1386_v12  ;;  %v1415_v31 = vld [vmem:[%s2083_s1 + $0x270] ss:$8 sps:$4 sm:$0xff]   ;;  %v1418_v33 = vld [vmem:[%s2083_s1 + $0x284] ss:$8 sps:$4 sm:$0xff]   ;;  %v1421_v35 = vld [vmem:[%s2083_s1 + $0x280] ss:$8 sps:$4 sm:$0xff]  }
   0xd   :  { %1016 = vmatprep.subr.bf16.mxu0 %v1388_v13  ;;  %v1422_v36 = vld [vmem:[%s2083_s1 + $0x94] ss:$8 sps:$4 sm:$0xff]   ;;  %v1426_v38 = vld [vmem:[%s2083_s1 + $0x90] ss:$8 sps:$4 sm:$0xff]   ;;  %v1428_v40 = vld [vmem:[%s2083_s1 + $0xa4] ss:$8 sps:$4 sm:$0xff]  }
   0xe   :  { %v1424_v37 = vld [vmem:[%s2083_s1 + $0x294] ss:$8 sps:$4 sm:$0xff]   ;;  %v1427_v39 = vld [vmem:[%s2083_s1 + $0x290] ss:$8 sps:$4 sm:$0xff]   ;;  %v1430_v41 = vld [vmem:[%s2083_s1 + $0x2a4] ss:$8 sps:$4 sm:$0xff]  }
   0xf   :  { %935 = vmatpush1.bf16.msra.mxu1 %v1390_v14  ;;  %v1432_v42 = vld [vmem:[%s2083_s1 + $0xa0] ss:$8 sps:$4 sm:$0xff]   ;;  %v1434_v44 = vld [vmem:[%s2083_s1 + $0xb4] ss:$8 sps:$4 sm:$0xff]   ;;  %v1438_v47 = vld [vmem:[%s2083_s1 + $0xb0] ss:$8 sps:$4 sm:$0xff]  }
  0x10   :  { %1017 = vmatpush1.bf16.msra.mxu0 %v1391_v15  ;;  %936 = vmatprep.subr.bf16.mxu1 %v1392_v16  ;;  %v1433_v43 = vld [vmem:[%s2083_s1 + $0x2a0] ss:$8 sps:$4 sm:$0xff]   ;;  %v1436_v45 = vld [vmem:[%s2083_s1 + $0x2b4] ss:$8 sps:$4 sm:$0xff]   ;;  %v1439_v49 = vld [vmem:[%s2083_s1 + $0x2b0] ss:$8 sps:$4 sm:$0xff]  }
  0x11   :  { %1018 = vmatprep.subr.bf16.mxu0 %v1394_v17  ;;  %v15_v46 = vld [vmem:[%s2084_s0] sm:$0xff]  ;;  %v17_v50 = vld [vmem:[%s2084_s0 + $0x10] sm:$0xff] }
  0x12   :  { %v1197_v48 = vcombine.high %v15_v46, %v15_v46  ;;  %v1440_v51 = vld [vmem:[%s2083_s1 + $0xc4] ss:$8 sps:$4 sm:$0xff]   ;;  %v1201_v53 = vcombine.high %v17_v50, %v17_v50  ;;  %v1444_v54 = vld [vmem:[%s2083_s1 + $0xc0] ss:$8 sps:$4 sm:$0xff]   ;;  %v1446_v56 = vld [vmem:[%s2083_s1 + $0xd4] ss:$8 sps:$4 sm:$0xff]   ;;  %v1196_v6 = vcombine.low %v15_v46, %v15_v46  ;;  %v1200_v7 = vcombine.low %v17_v50, %v17_v50 }
  0x13   :  { %937 = vmatpush1.bf16.msra.mxu1 %v1396_v18  ;;  %v1442_v52 = vld [vmem:[%s2083_s1 + $0x2c4] ss:$8 sps:$4 sm:$0xff]   ;;  %v1445_v55 = vld [vmem:[%s2083_s1 + $0x2c0] ss:$8 sps:$4 sm:$0xff]   ;;  %v1448_v57 = vld [vmem:[%s2083_s1 + $0x2d4] ss:$8 sps:$4 sm:$0xff]  }
  0x14   :  { %1019 = vmatpush1.bf16.msra.mxu0 %v1397_v19  ;;  %938 = vmatprep.subr.bf16.mxu1 %v1398_v20  ;;  %v1450_v58 = vld [vmem:[%s2083_s1 + $0xd0] ss:$8 sps:$4 sm:$0xff]   ;;  %v1452_v60 = vld [vmem:[%s2083_s1 + $0xe4] ss:$8 sps:$4 sm:$0xff]   ;;  %v1456_v62 = vld [vmem:[%s2083_s1 + $0xe0] ss:$8 sps:$4 sm:$0xff]  }
  0x15   :  { %1020 = vmatprep.subr.bf16.mxu0 %v1400_v21  ;;  %960 = vmatprep.mubr.bf16.mxu1 %v1197_v48  ;;  %v1451_v59 = vld [vmem:[%s2083_s1 + $0x2d0] ss:$8 sps:$4 sm:$0xff]   ;;  %v1454_v61 = vld [vmem:[%s2083_s1 + $0x2e4] ss:$8 sps:$4 sm:$0xff]   ;;  %v1457_v63 = vld [vmem:[%s2083_s1 + $0x2e0] ss:$8 sps:$4 sm:$0xff]  }
  0x16   :  { %1042 = vmatprep.mubr.bf16.mxu0 %v1201_v53  ;;  %v1458_v0 = vld [vmem:[%s2083_s1 + $0xf4] ss:$8 sps:$4 sm:$0xff]   ;;  %v1462_v2 = vld [vmem:[%s2083_s1 + $0xf0] ss:$8 sps:$4 sm:$0xff]   ;;  %v1468_v4 = vld [vmem:[%s2083_s1 + $0x104] ss:$8 sps:$4 sm:$0xff]  }
  0x17   :  { %939 = vmatpush1.bf16.msra.mxu1 %v1402_v22  ;;  %v1460_v1 = vld [vmem:[%s2083_s1 + $0x2f4] ss:$8 sps:$4 sm:$0xff]   ;;  %v1463_v3 = vld [vmem:[%s2083_s1 + $0x2f0] ss:$8 sps:$4 sm:$0xff]   ;;  %v1473_v5 = vld [vmem:[%s2083_s1 + $0x304] ss:$8 sps:$4 sm:$0xff]  }
  0x18   :  { %1021 = vmatpush1.bf16.msra.mxu0 %v1403_v23  ;;  %940 = vmatprep.subr.bf16.mxu1 %v1404_v24  ;;  %v1466_v8 = vld [vmem:[%s2083_s1 + $0x100] ss:$8 sps:$4 sm:$0xff]   ;;  %v1476_v10 = vld [vmem:[%s2083_s1 + $0x114] ss:$8 sps:$4 sm:$0xff]   ;;  %v1474_v12 = vld [vmem:[%s2083_s1 + $0x110] ss:$8 sps:$4 sm:$0xff]  }
  0x19   :  { %1022 = vmatprep.subr.bf16.mxu0 %v1406_v25  ;;  %v1471_v9 = vld [vmem:[%s2083_s1 + $0x300] ss:$8 sps:$4 sm:$0xff]   ;;  %v1479_v11 = vld [vmem:[%s2083_s1 + $0x314] ss:$8 sps:$4 sm:$0xff]   ;;  %v1477_v13 = vld [vmem:[%s2083_s1 + $0x310] ss:$8 sps:$4 sm:$0xff]  }
  0x1a   :  { %v1482_v14 = vld [vmem:[%s2083_s1 + $0x124] ss:$8 sps:$4 sm:$0xff]   ;;  %v1480_v16 = vld [vmem:[%s2083_s1 + $0x120] ss:$8 sps:$4 sm:$0xff]   ;;  %v1488_v18 = vld [vmem:[%s2083_s1 + $0x134] ss:$8 sps:$4 sm:$0xff]  }
  0x1b   :  { %941 = vmatpush1.bf16.msra.mxu1 %v1408_v26  ;;  %v1485_v15 = vld [vmem:[%s2083_s1 + $0x324] ss:$8 sps:$4 sm:$0xff]   ;;  %v1483_v17 = vld [vmem:[%s2083_s1 + $0x320] ss:$8 sps:$4 sm:$0xff]   ;;  %v1491_v19 = vld [vmem:[%s2083_s1 + $0x334] ss:$8 sps:$4 sm:$0xff]  }
  0x1c   :  { %1023 = vmatpush1.bf16.msra.mxu0 %v1409_v27  ;;  %942 = vmatprep.subr.bf16.mxu1 %v1410_v28  ;;  %v1486_v20 = vld [vmem:[%s2083_s1 + $0x130] ss:$8 sps:$4 sm:$0xff]   ;;  %v1494_v22 = vld [vmem:[%s2083_s1 + $0x144] ss:$8 sps:$4 sm:$0xff]   ;;  %v1492_v24 = vld [vmem:[%s2083_s1 + $0x140] ss:$8 sps:$4 sm:$0xff]  }
  0x1d   :  { %1024 = vmatprep.subr.bf16.mxu0 %v1412_v29  ;;  %v1489_v21 = vld [vmem:[%s2083_s1 + $0x330] ss:$8 sps:$4 sm:$0xff]   ;;  %v1497_v23 = vld [vmem:[%s2083_s1 + $0x344] ss:$8 sps:$4 sm:$0xff]   ;;  %v1495_v25 = vld [vmem:[%s2083_s1 + $0x340] ss:$8 sps:$4 sm:$0xff]  }
  0x1e   :  { %v1500_v26 = vld [vmem:[%s2083_s1 + $0x154] ss:$8 sps:$4 sm:$0xff]   ;;  %v1498_v28 = vld [vmem:[%s2083_s1 + $0x150] ss:$8 sps:$4 sm:$0xff]   ;;  %v1530_v50 = vld [vmem:[%s2083_s1 + $0x1a4] ss:$8 sps:$4 sm:$0xff]  }
  0x1f   :  { %943 = vmatpush1.bf16.msra.mxu1 %v1414_v30  ;;  %v1503_v27 = vld [vmem:[%s2083_s1 + $0x354] ss:$8 sps:$4 sm:$0xff]   ;;  %v1501_v29 = vld [vmem:[%s2083_s1 + $0x350] ss:$8 sps:$4 sm:$0xff]   ;;  %v1506_v30 = vld [vmem:[%s2083_s1 + $0x164] ss:$8 sps:$4 sm:$0xff]  }
  0x20   :  { %1025 = vmatpush1.bf16.msra.mxu0 %v1415_v31  ;;  %944 = vmatprep.subr.bf16.mxu1 %v1416_v32  ;;  %v1509_v31 = vld [vmem:[%s2083_s1 + $0x364] ss:$8 sps:$4 sm:$0xff]   ;;  %v1524_v46 = vld [vmem:[%s2083_s1 + $0x194] ss:$8 sps:$4 sm:$0xff]   ;;  %v1522_v48 = vld [vmem:[%s2083_s1 + $0x190] ss:$8 sps:$4 sm:$0xff]  }
  0x21   :  { %1026 = vmatprep.subr.bf16.mxu0 %v1418_v33  ;;  %v1897_v32 = vld [vmem:[%s2084_s0 + $0x8] sm:$0xff]  ;;  %v1902_v33 = vld [vmem:[%s2084_s0 + $0x18] sm:$0xff] }
  0x22   :  { %v1531_v53 = vld [vmem:[%s2083_s1 + $0x3a0] ss:$8 sps:$4 sm:$0xff]  }
  0x23   :  { %945 = vmatpush1.bf16.msra.mxu1 %v1420_v34  ;;  %v1504_v34 = vld [vmem:[%s2083_s1 + $0x160] ss:$8 sps:$4 sm:$0xff]  }
  0x24   :  { %1027 = vmatpush1.bf16.msra.mxu0 %v1421_v35  ;;  %946 = vmatprep.subr.bf16.mxu1 %v1422_v36  ;;  %v1507_v35 = vld [vmem:[%s2083_s1 + $0x360] ss:$8 sps:$4 sm:$0xff]   ;;  %v1199_v36 = vcombine.high %v1897_v32, %v1897_v32 }
  0x25   :  { %1028 = vmatprep.subr.bf16.mxu0 %v1424_v37  ;;  %v1203_v37 = vcombine.high %v1902_v33, %v1902_v33 }
  0x27   :  { %947 = vmatpush1.bf16.msra.mxu1 %v1426_v38  ;;  %v1512_v38 = vld [vmem:[%s2083_s1 + $0x174] ss:$8 sps:$4 sm:$0xff]  }
  0x28   :  { %1029 = vmatpush1.bf16.msra.mxu0 %v1427_v39  ;;  %948 = vmatprep.subr.bf16.mxu1 %v1428_v40  ;;  %v1515_v39 = vld [vmem:[%s2083_s1 + $0x374] ss:$8 sps:$4 sm:$0xff]   ;;  %v1510_v40 = vld [vmem:[%s2083_s1 + $0x170] ss:$8 sps:$4 sm:$0xff]  }
  0x29   :  { %1030 = vmatprep.subr.bf16.mxu0 %v1430_v41  ;;  %v1513_v41 = vld [vmem:[%s2083_s1 + $0x370] ss:$8 sps:$4 sm:$0xff]  }
  0x2b   :  { %949 = vmatpush1.bf16.msra.mxu1 %v1432_v42  ;;  %v1518_v42 = vld [vmem:[%s2083_s1 + $0x184] ss:$8 sps:$4 sm:$0xff]  }
  0x2c   :  { %1031 = vmatpush1.bf16.msra.mxu0 %v1433_v43  ;;  %950 = vmatprep.subr.bf16.mxu1 %v1434_v44  ;;  %v1521_v43 = vld [vmem:[%s2083_s1 + $0x384] ss:$8 sps:$4 sm:$0xff]   ;;  %v1516_v44 = vld [vmem:[%s2083_s1 + $0x180] ss:$8 sps:$4 sm:$0xff]  }
  0x2d   :  { %1032 = vmatprep.subr.bf16.mxu0 %v1436_v45  ;;  %v1519_v45 = vld [vmem:[%s2083_s1 + $0x380] ss:$8 sps:$4 sm:$0xff]  }
  0x2f   :  { %951 = vmatpush1.bf16.msra.mxu1 %v1438_v47  ;;  %v1527_v47 = vld [vmem:[%s2083_s1 + $0x394] ss:$8 sps:$4 sm:$0xff]  }
  0x30   :  { %1033 = vmatpush1.bf16.msra.mxu0 %v1439_v49  ;;  %952 = vmatprep.subr.bf16.mxu1 %v1440_v51  ;;  %v1525_v49 = vld [vmem:[%s2083_s1 + $0x390] ss:$8 sps:$4 sm:$0xff]   ;;  %v1533_v51 = vld [vmem:[%s2083_s1 + $0x3a4] ss:$8 sps:$4 sm:$0xff]  }
  0x31   :  { %1034 = vmatprep.subr.bf16.mxu0 %v1442_v52  ;;  %v1528_v52 = vld [vmem:[%s2083_s1 + $0x1a0] ss:$8 sps:$4 sm:$0xff]  }
  0x33   :  { %953 = vmatpush1.bf16.msra.mxu1 %v1444_v54  ;;  %v1536_v54 = vld [vmem:[%s2083_s1 + $0x1b4] ss:$8 sps:$4 sm:$0xff]  }
  0x34   :  { %1035 = vmatpush1.bf16.msra.mxu0 %v1445_v55  ;;  %954 = vmatprep.subr.bf16.mxu1 %v1446_v56  ;;  %v1539_v55 = vld [vmem:[%s2083_s1 + $0x3b4] ss:$8 sps:$4 sm:$0xff]   ;;  %v1534_v56 = vld [vmem:[%s2083_s1 + $0x1b0] ss:$8 sps:$4 sm:$0xff]  }
  0x35   :  { %1036 = vmatprep.subr.bf16.mxu0 %v1448_v57  ;;  %v1537_v57 = vld [vmem:[%s2083_s1 + $0x3b0] ss:$8 sps:$4 sm:$0xff]  }
  0x37   :  { %955 = vmatpush1.bf16.msra.mxu1 %v1450_v58  ;;  %v1542_v58 = vld [vmem:[%s2083_s1 + $0x1c4] ss:$8 sps:$4 sm:$0xff]  }
  0x38   :  { %1037 = vmatpush1.bf16.msra.mxu0 %v1451_v59  ;;  %956 = vmatprep.subr.bf16.mxu1 %v1452_v60  ;;  %v1545_v59 = vld [vmem:[%s2083_s1 + $0x3c4] ss:$8 sps:$4 sm:$0xff]   ;;  %v1540_v60 = vld [vmem:[%s2083_s1 + $0x1c0] ss:$8 sps:$4 sm:$0xff]  }
  0x39   :  { %1038 = vmatprep.subr.bf16.mxu0 %v1454_v61  ;;  %v1543_v61 = vld [vmem:[%s2083_s1 + $0x3c0] ss:$8 sps:$4 sm:$0xff]  }
  0x3b   :  { %957 = vmatpush1.bf16.msra.mxu1 %v1456_v62  ;;  %v1548_v62 = vld [vmem:[%s2083_s1 + $0x1d4] ss:$8 sps:$4 sm:$0xff]  }
  0x3c   :  { %1039 = vmatpush1.bf16.msra.mxu0 %v1457_v63  ;;  %958 = vmatprep.subr.bf16.mxu1 %v1458_v0  ;;  %v1551_v63 = vld [vmem:[%s2083_s1 + $0x3d4] ss:$8 sps:$4 sm:$0xff]   ;;  %v1546_v0 = vld [vmem:[%s2083_s1 + $0x1d0] ss:$8 sps:$4 sm:$0xff]  }
  0x3d   :  { %1040 = vmatprep.subr.bf16.mxu0 %v1460_v1  ;;  %v1549_v1 = vld [vmem:[%s2083_s1 + $0x3d0] ss:$8 sps:$4 sm:$0xff]  }
  0x3f   :  { %959 = vmatpush1.bf16.msra.mxu1 %v1462_v2  ;;  %v1554_v2 = vld [vmem:[%s2083_s1 + $0x1e4] ss:$8 sps:$4 sm:$0xff]  }
  0x40   :  { %1041 = vmatpush1.bf16.msra.mxu0 %v1463_v3  ;;  %969 = vmatprep.subr.bf16.mxu1 %v1468_v4  ;;  %v1557_v3 = vld [vmem:[%s2083_s1 + $0x3e4] ss:$8 sps:$4 sm:$0xff]   ;;  %v1552_v4 = vld [vmem:[%s2083_s1 + $0x1e0] ss:$8 sps:$4 sm:$0xff]  }
  0x41   :  { %1051 = vmatprep.subr.bf16.mxu0 %v1473_v5  ;;  %v1555_v5 = vld [vmem:[%s2083_s1 + $0x3e0] ss:$8 sps:$4 sm:$0xff]  }
  0x42   :  { %961 = vmatmul.mubr.bf16.vlgmr.msra.gmra.mrb[0].mxu1 %v1196_v6  ;;  %v1560_v6 = vld [vmem:[%s2083_s1 + $0x1f4] ss:$8 sps:$4 sm:$0xff]  }
  0x43   :  { %1043 = vmatmul.mubr.bf16.vlgmr.msra.gmra.mrb[0].mxu0 %v1200_v7  ;;  %970 = vmatpush1.bf16.msra.mxu1 %v1466_v8  ;;  %v1563_v7 = vld [vmem:[%s2083_s1 + $0x3f4] ss:$8 sps:$4 sm:$0xff]   ;;  %v1558_v8 = vld [vmem:[%s2083_s1 + $0x1f0] ss:$8 sps:$4 sm:$0xff]  }
  0x44   :  { %1052 = vmatpush1.bf16.msra.mxu0 %v1471_v9  ;;  %971 = vmatprep.subr.bf16.mxu1 %v1476_v10  ;;  %v1561_v9 = vld [vmem:[%s2083_s1 + $0x3f0] ss:$8 sps:$4 sm:$0xff]   ;;  %v1570_v10 = vld [vmem:[%s2083_s1 + $0x404] ss:$8 sps:$4 sm:$0xff]  }
  0x45   :  { %1053 = vmatprep.subr.bf16.mxu0 %v1479_v11  ;;  %1001 = vmatprep.mubr.bf16.mxu1 %v1199_v36  ;;  %v1198_v11 = vcombine.low %v1897_v32, %v1897_v32 }
  0x46   :  { %1083 = vmatprep.mubr.bf16.mxu0 %v1203_v37  ;;  %v164_v37 = vld [vmem:[%s2085_s2] sm:$0x3] }
  0x47   :  { %972 = vmatpush1.bf16.msra.mxu1 %v1474_v12  ;;  %v1202_v12 = vcombine.low %v1902_v33, %v1902_v33 }
  0x48   :  { %1054 = vmatpush1.bf16.msra.mxu0 %v1477_v13  ;;  %973 = vmatprep.subr.bf16.mxu1 %v1482_v14  ;;  %v1568_v13 = vld [vmem:[%s2083_s1 + $0x400] ss:$8 sps:$4 sm:$0xff]   ;;  %v1573_v14 = vld [vmem:[%s2083_s1 + $0x414] ss:$8 sps:$4 sm:$0xff]  }
  0x49   :  { %1055 = vmatprep.subr.bf16.mxu0 %v1485_v15  ;;  %v1571_v15 = vld [vmem:[%s2083_s1 + $0x410] ss:$8 sps:$4 sm:$0xff]  }
  0x4b   :  { %974 = vmatpush1.bf16.msra.mxu1 %v1480_v16  ;;  %v1597_v16 = vmov 0  }
  0x4c   :  { %1056 = vmatpush1.bf16.msra.mxu0 %v1483_v17  ;;  %975 = vmatprep.subr.bf16.mxu1 %v1488_v18  ;;  %v1576_v17 = vld [vmem:[%s2083_s1 + $0x424] ss:$8 sps:$4 sm:$0xff]   ;;  %v1574_v18 = vld [vmem:[%s2083_s1 + $0x420] ss:$8 sps:$4 sm:$0xff]  }
  0x4d   :  { %1057 = vmatprep.subr.bf16.mxu0 %v1491_v19  ;;  %v1579_v19 = vld [vmem:[%s2083_s1 + $0x434] ss:$8 sps:$4 sm:$0xff]  }
  0x4f   :  { %976 = vmatpush1.bf16.msra.mxu1 %v1486_v20  ;;  %v1577_v20 = vld [vmem:[%s2083_s1 + $0x430] ss:$8 sps:$4 sm:$0xff]  }
  0x50   :  { %1058 = vmatpush1.bf16.msra.mxu0 %v1489_v21  ;;  %977 = vmatprep.subr.bf16.mxu1 %v1494_v22  ;;  %v1582_v21 = vld [vmem:[%s2083_s1 + $0x444] ss:$8 sps:$4 sm:$0xff]   ;;  %v1580_v22 = vld [vmem:[%s2083_s1 + $0x440] ss:$8 sps:$4 sm:$0xff]  }
  0x51   :  { %1059 = vmatprep.subr.bf16.mxu0 %v1497_v23  ;;  %v1585_v23 = vld [vmem:[%s2083_s1 + $0x454] ss:$8 sps:$4 sm:$0xff]  }
  0x53   :  { %978 = vmatpush1.bf16.msra.mxu1 %v1492_v24  ;;  %v1583_v24 = vld [vmem:[%s2083_s1 + $0x450] ss:$8 sps:$4 sm:$0xff]  }
  0x54   :  { %1060 = vmatpush1.bf16.msra.mxu0 %v1495_v25  ;;  %979 = vmatprep.subr.bf16.mxu1 %v1500_v26  ;;  %v1588_v25 = vld [vmem:[%s2083_s1 + $0x464] ss:$8 sps:$4 sm:$0xff]   ;;  %v1586_v26 = vld [vmem:[%s2083_s1 + $0x460] ss:$8 sps:$4 sm:$0xff]  }
  0x55   :  { %1061 = vmatprep.subr.bf16.mxu0 %v1503_v27  ;;  %v1591_v27 = vld [vmem:[%s2083_s1 + $0x474] ss:$8 sps:$4 sm:$0xff]  }
  0x57   :  { %980 = vmatpush1.bf16.msra.mxu1 %v1498_v28  ;;  %v1589_v28 = vld [vmem:[%s2083_s1 + $0x470] ss:$8 sps:$4 sm:$0xff]  }
  0x58   :  { %1062 = vmatpush1.bf16.msra.mxu0 %v1501_v29  ;;  %981 = vmatprep.subr.bf16.mxu1 %v1506_v30  ;;  %v1592_v29 = vld [vmem:[%s2084_s0 + $0x20] ss:$0 sps:$4 sm:$0xff]  }
  0x59   :  { %1063 = vmatprep.subr.bf16.mxu0 %v1509_v31 }
  0x5b   :  { %982 = vmatpush1.bf16.msra.mxu1 %v1504_v34  ;;  %v166_v34 = vlaneseq }
  0x5c   :  { %1064 = vmatpush1.bf16.msra.mxu0 %v1507_v35  ;;  %983 = vmatprep.subr.bf16.mxu1 %v1512_v38 }
  0x5d   :  { %1065 = vmatprep.subr.bf16.mxu0 %v1515_v39  ;;  %v167_v35 = vshrl.u32 %v166_v34, 7 }
  0x5f   :  { %984 = vmatpush1.bf16.msra.mxu1 %v1510_v40  ;;  %v168_v36 = vsub.s32 0, %v167_v35  ;;  %v172_v38 = vsub.s32 1, %v167_v35 }
  0x60   :  { %1066 = vmatpush1.bf16.msra.mxu0 %v1513_v41  ;;  %985 = vmatprep.subr.bf16.mxu1 %v1518_v42 }
  0x61   :  { %1067 = vmatprep.subr.bf16.mxu0 %v1521_v43  ;;  %v169_v39 = vrot.slane %v164_v37, %v168_v36  ;;  %v173_v40 = vrot.slane %v164_v37, %v172_v38 }
  0x63   :  { %986 = vmatpush1.bf16.msra.mxu1 %v1516_v44 }
  0x64   :  { %1068 = vmatpush1.bf16.msra.mxu0 %v1519_v45  ;;  %987 = vmatprep.subr.bf16.mxu1 %v1524_v46 }
  0x65   :  { %1069 = vmatprep.subr.bf16.mxu0 %v1527_v47 }
  0x67   :  { %988 = vmatpush1.bf16.msra.mxu1 %v1522_v48 }
  0x68   :  { %1070 = vmatpush1.bf16.msra.mxu0 %v1525_v49  ;;  %989 = vmatprep.subr.bf16.mxu1 %v1530_v50 }
  0x69   :  { %1071 = vmatprep.subr.bf16.mxu0 %v1533_v51 }
  0x6b   :  { %990 = vmatpush1.bf16.msra.mxu1 %v1528_v52 }
  0x6c   :  { %1072 = vmatpush1.bf16.msra.mxu0 %v1531_v53  ;;  %991 = vmatprep.subr.bf16.mxu1 %v1536_v54 }
  0x6d   :  { %1073 = vmatprep.subr.bf16.mxu0 %v1539_v55 }
  0x6f   :  { %992 = vmatpush1.bf16.msra.mxu1 %v1534_v56 }
  0x70   :  { %1074 = vmatpush1.bf16.msra.mxu0 %v1537_v57  ;;  %993 = vmatprep.subr.bf16.mxu1 %v1542_v58 }
  0x71   :  { %1075 = vmatprep.subr.bf16.mxu0 %v1545_v59 }
  0x73   :  { %994 = vmatpush1.bf16.msra.mxu1 %v1540_v60 }
  0x74   :  { %1076 = vmatpush1.bf16.msra.mxu0 %v1543_v61  ;;  %995 = vmatprep.subr.bf16.mxu1 %v1548_v62 }
  0x75   :  { %1077 = vmatprep.subr.bf16.mxu0 %v1551_v63 }
  0x77   :  { %996 = vmatpush1.bf16.msra.mxu1 %v1546_v0 }
  0x78   :  { %1078 = vmatpush1.bf16.msra.mxu0 %v1549_v1  ;;  %997 = vmatprep.subr.bf16.mxu1 %v1554_v2 }
  0x79   :  { %1079 = vmatprep.subr.bf16.mxu0 %v1557_v3 }
  0x7b   :  { %998 = vmatpush1.bf16.msra.mxu1 %v1552_v4 }
  0x7c   :  { %1080 = vmatpush1.bf16.msra.mxu0 %v1555_v5  ;;  %999 = vmatprep.subr.bf16.mxu1 %v1560_v6 }
  0x7d   :  { %1081 = vmatprep.subr.bf16.mxu0 %v1563_v7 }
  0x7f   :  { %1000 = vmatpush1.bf16.msra.mxu1 %v1558_v8 }
  0x80   :  { %1082 = vmatpush1.bf16.msra.mxu0 %v1561_v9 }
  0x81   :  { %1092 = vmatprep.subr.bf16.mxu0 %v1570_v10 }
  0x82   :  { %1002 = vmatmul.mubr.bf16.vlgmr.msra.gmra.mrb[0].mxu1 %v1198_v11 }
  0x83   :  { %1084 = vmatmul.mubr.bf16.vlgmr.msra.gmra.mrb[0].mxu0 %v1202_v12 }
  0x84   :  { %1093 = vmatpush1.bf16.msra.mxu0 %v1568_v13  ;;  %1124 = vmatprep.mubr.bf16.mxu0 %v1597_v16 }
  0x85   :  { %1094 = vmatprep.subr.bf16.mxu0 %v1573_v14 }
  0x88   :  { %1095 = vmatpush1.bf16.msra.mxu0 %v1571_v15 }
  0x89   :  { %1096 = vmatprep.subr.bf16.mxu0 %v1576_v17 }
  0x8c   :  { %1097 = vmatpush1.bf16.msra.mxu0 %v1574_v18 }
  0x8d   :  { %1098 = vmatprep.subr.bf16.mxu0 %v1579_v19 }
  0x90   :  { %1099 = vmatpush1.bf16.msra.mxu0 %v1577_v20 }
  0x91   :  { %1100 = vmatprep.subr.bf16.mxu0 %v1582_v21 }
  0x94   :  { %1101 = vmatpush1.bf16.msra.mxu0 %v1580_v22 }
  0x95   :  { %1102 = vmatprep.subr.bf16.mxu0 %v1585_v23 }
  0x98   :  { %1103 = vmatpush1.bf16.msra.mxu0 %v1583_v24 }
  0x99   :  { %1104 = vmatprep.subr.bf16.mxu0 %v1588_v25 }
  0x9c   :  { %1105 = vmatpush1.bf16.msra.mxu0 %v1586_v26 }
  0x9d   :  { %1106 = vmatprep.subr.bf16.mxu0 %v1591_v27 }
  0xa0   :  { %1107 = vmatpush1.bf16.msra.mxu0 %v1589_v28 }
  0xa3   :  { %1125 = vmatmul.mubr.bf16.vlgmr.msra.gmra.mrb[0].mxu0 %v1592_v29 }
 0x155   :  { %v1003_v30 = vpop.f32.mrb[0].mxu1 }
 0x156   :  { %v1005_v31 = vpop.f32.mrb[1].mxu1  ;;  %v1351_v41 = vadd.f32 %v1003_v30, %v169_v39 }
 0x157   :  { %v1007_v32 = vpop.f32.mrb[2].mxu1  ;;  %v1353_v42 = vadd.f32 %v1005_v31, %v173_v40 }
 0x158   :  { %v1008_v33 = vpop.f32.mrb[3].mxu1 }
 0x176   :  { %v1126_v43 = vpop.f32.mrb[0].mxu0 }
 0x177   :  { %v1352_v44 = vadd.f32 %v1351_v41, %v1126_v43  ;;  %v1128_v45 = vpop.f32.mrb[1].mxu0 }
 0x178   :  { %v1354_v46 = vadd.f32 %v1353_v42, %v1128_v45  ;;  %v1130_v47 = vpop.f32.mrb[2].mxu0 }
 0x179   :  { %v1133_v48 = vrot.slane %v1352_v44, 4  ;;  %v1145_v49 = vmul.f32 %v1352_v44, %v1352_v44  ;;  %v1131_v50 = vpop.f32.mrb[3].mxu0 }
 0x17a   :  { %v1139_v51 = vrot.slane %v1354_v46, 4  ;;  %v1146_v52 = vmul.f32 %v1354_v46, %v1354_v46 }
 0x17b   :  { %v1134_v53 = vadd.f32 %v1352_v44, %v1133_v48  ;;  %v1147_v54 = vrot.slane %v1145_v49, 4 }
 0x17c   :  { %v1140_v55 = vadd.f32 %v1354_v46, %v1139_v51  ;;  %v1153_v56 = vrot.slane %v1146_v52, 4 }
 0x17d   :  { %v1135_v57 = vrot.slane %v1134_v53, 2  ;;  %v1148_v58 = vadd.f32 %v1147_v54, %v1145_v49 }
 0x17e   :  { %v1141_v59 = vrot.slane %v1140_v55, 2  ;;  %v1154_v60 = vadd.f32 %v1153_v56, %v1146_v52 }
 0x17f   :  { %v1136_v61 = vadd.f32 %v1135_v57, %v1134_v53  ;;  %v1149_v62 = vrot.slane %v1148_v58, 2 }
 0x180   :  { %v1142_v63 = vadd.f32 %v1141_v59, %v1140_v55  ;;  %v1155_v0 = vrot.slane %v1154_v60, 2 }
 0x181   :  { %v1137_v1 = vrot.slane %v1136_v61, 1  ;;  %v1150_v2 = vadd.f32 %v1149_v62, %v1148_v58 }
 0x182   :  { %v1143_v3 = vrot.slane %v1142_v63, 1  ;;  %v1156_v4 = vadd.f32 %v1155_v0, %v1154_v60 }
 0x183   :  { %v1138_v5 = vadd.f32 %v1137_v1, %v1136_v61  ;;  %v1151_v6 = vrot.slane %v1150_v2, 1 }
 0x184   :  { %v1144_v7 = vadd.f32 %v1143_v3, %v1142_v63  ;;  %v1157_v8 = vrot.slane %v1156_v4, 1 }
 0x185   :  { %v1152_v9 = vadd.f32 %v1151_v6, %v1150_v2  ;;  %v1159_v10 = vmul.f32 0.125, %v1138_v5 }
 0x186   :  { %v1158_v11 = vadd.f32 %v1157_v8, %v1156_v4  ;;  %v1160_v12 = vmul.f32 0.125, %v1144_v7 }
 0x187   :  { %v1161_v13 = vmul.f32 0.125, %v1152_v9  ;;  %v1163_v14 = vmul.f32 %v1159_v10, %v1159_v10  ;;  %v1169_v23 = vsub.f32 %v1352_v44, %v1159_v10 }
 0x188   :  { %v1162_v15 = vmul.f32 0.125, %v1158_v11  ;;  %v1164_v16 = vmul.f32 %v1160_v12, %v1160_v12  ;;  %v1170_v25 = vsub.f32 %v1354_v46, %v1160_v12 }
 0x189   :  { %v1165_v17 = vsub.f32 %v1161_v13, %v1163_v14 }
 0x18a   :  { %v1166_v18 = vsub.f32 %v1162_v15, %v1164_v16 }
 0x18b   :  { %v1167_v19 = vmax.f32 %v1165_v17, 0.0 }
 0x18c   :  { %v1168_v20 = vmax.f32 %v1166_v18, 0.0 }
 0x18d   :  { %v1171_v21 = vadd.f32 1e-05, %v1167_v19 }
 0x18e   :  { %v1172_v22 = vadd.f32 1e-05, %v1168_v20 }
 0x18f   :  { %1593 = vrsqrt.f32 %v1171_v21 }
 0x190   :  { %1595 = vrsqrt.f32 %v1172_v22 }
 0x199   :  { %v1594_v24 = vpop.eup %1593 }
 0x19a   :  { %v1596_v26 = vpop.eup %1595  ;;  %v1175_v27 = vmul.f32 %v1594_v24, %v1169_v23 }
 0x19b   :  { %v1176_v28 = vmul.f32 %v1596_v26, %v1170_v25 }
 0x19c   :  { %vm1177_vm0 = vcmp.gt.f32.partialorder %v1175_v27, 0.0  ;;  %v1179_v29 = vmul.f32 0.2, %v1175_v27 }
 0x19d   :  { %vm1178_vm1 = vcmp.gt.f32.partialorder %v1176_v28, 0.0  ;;  %v1180_v30 = vmul.f32 0.2, %v1176_v28 }
 0x19e   :  { %v1181_v31 = vsel %vm1177_vm0, %v1175_v27, %v1179_v29 }
 0x19f   :  { %v1182_v32 = vsel %vm1178_vm1, %v1176_v28, %v1180_v30 }
 0x1a0   :  { %v1350_v33 = vpack.c.bf16 %v1182_v32, %v1181_v31 }
 0x1a2   :  { %1191 = vst [vmem:[%s2086_s3] sm:$0xff] %v1350_v33 }

// kernel: discriminator_forward.7
= control target key start
LH: loop header
LB: loop body
LE: loop exit
PB: predicated region body
PF: predicated region fallthrough
CT: control target
= control target key end

     0   :  { %s2630_s1 = inlined_call_operand.vmem [shape: bf16[2304,128], index: 1, kind: input, shape index: {}]   ;;  %s2631_s0 = inlined_call_operand.vmem [shape: bf16[8,2304], index: 0, kind: input, shape index: {}]   ;;  %s2632_s2 = inlined_call_operand.vmem [shape: f32[1,128], index: 2, kind: input, shape index: {}]   ;;  %s2633_s3 = inlined_call_operand.vmem [shape: f32[8,128], index: 3, kind: output, shape index: {}]  }
   0x1   :  { %v1979_v0 = vld [vmem:[%s2630_s1 + $0x40] sm:$0xff]   ;;  %v1983_v4 = vld [vmem:[%s2630_s1 + $0x48] sm:$0xff]   ;;  %v1987_v8 = vld [vmem:[%s2630_s1 + $0x50] sm:$0xff]  }
   0x2   :  { %v1980_v1 = vld [vmem:[%s2630_s1] sm:$0xff]   ;;  %1781 = vmatprep.subr.bf16.mxu0 %v1979_v0  ;;  %v1984_v5 = vld [vmem:[%s2630_s1 + $0x8] sm:$0xff]   ;;  %v1988_v9 = vld [vmem:[%s2630_s1 + $0x10] sm:$0xff]  }
   0x3   :  { %v1981_v2 = vld [vmem:[%s2630_s1 + $0xc0] sm:$0xff]   ;;  %1782 = vmatpush3.bf16.msra.mxu0 %v1980_v1  ;;  %v1985_v6 = vld [vmem:[%s2630_s1 + $0xc8] sm:$0xff]   ;;  %v1989_v10 = vld [vmem:[%s2630_s1 + $0xd0] sm:$0xff]  }
   0x4   :  { %v1982_v3 = vld [vmem:[%s2630_s1 + $0x80] sm:$0xff]   ;;  %1803 = vmatprep.subr.bf16.mxu1 %v1981_v2  ;;  %1783 = vmatprep.subr.bf16.mxu0 %v1983_v4  ;;  %v1986_v7 = vld [vmem:[%s2630_s1 + $0x88] sm:$0xff]   ;;  %v1990_v11 = vld [vmem:[%s2630_s1 + $0x90] sm:$0xff]  }
   0x5   :  { %1804 = vmatpush3.bf16.msra.mxu1 %v1982_v3  ;;  %v1991_v12 = vld [vmem:[%s2630_s1 + $0x58] sm:$0xff]   ;;  %v1995_v16 = vld [vmem:[%s2630_s1 + $0x60] sm:$0xff]   ;;  %v1999_v20 = vld [vmem:[%s2630_s1 + $0x68] sm:$0xff]  }
   0x6   :  { %1805 = vmatprep.subr.bf16.mxu1 %v1985_v6  ;;  %v1992_v13 = vld [vmem:[%s2630_s1 + $0x18] sm:$0xff]   ;;  %v1996_v17 = vld [vmem:[%s2630_s1 + $0x20] sm:$0xff]   ;;  %v2000_v21 = vld [vmem:[%s2630_s1 + $0x28] sm:$0xff]  }
   0x7   :  { %1784 = vmatpush3.bf16.msra.mxu0 %v1984_v5  ;;  %v1993_v14 = vld [vmem:[%s2630_s1 + $0xd8] sm:$0xff]   ;;  %v1997_v18 = vld [vmem:[%s2630_s1 + $0xe0] sm:$0xff]   ;;  %v2001_v22 = vld [vmem:[%s2630_s1 + $0xe8] sm:$0xff]  }
   0x8   :  { %1785 = vmatprep.subr.bf16.mxu0 %v1987_v8  ;;  %v1994_v15 = vld [vmem:[%s2630_s1 + $0x98] sm:$0xff]   ;;  %v1998_v19 = vld [vmem:[%s2630_s1 + $0xa0] sm:$0xff]   ;;  %v2002_v23 = vld [vmem:[%s2630_s1 + $0xa8] sm:$0xff]  }
   0x9   :  { %1806 = vmatpush3.bf16.msra.mxu1 %v1986_v7  ;;  %v2003_v24 = vld [vmem:[%s2630_s1 + $0x70] sm:$0xff]   ;;  %v2007_v28 = vld [vmem:[%s2630_s1 + $0x78] sm:$0xff]   ;;  %v15_v31 = vld [vmem:[%s2631_s0] sm:$0xff] }
   0xa   :  { %1807 = vmatprep.subr.bf16.mxu1 %v1989_v10  ;;  %v2004_v25 = vld [vmem:[%s2630_s1 + $0x30] sm:$0xff]   ;;  %v2008_v29 = vld [vmem:[%s2630_s1 + $0x38] sm:$0xff]   ;;  %v1618_v32 = vcombine.low %v15_v31, %v15_v31  ;;  %v1619_v33 = vcombine.high %v15_v31, %v15_v31  ;;  %v2013_v35 = vld [vmem:[%s2630_s1 + $0x140] sm:$0xff]  }
   0xb   :  { %1786 = vmatpush3.bf16.msra.mxu0 %v1988_v9  ;;  %v2005_v26 = vld [vmem:[%s2630_s1 + $0xf0] sm:$0xff]   ;;  %v2009_v30 = vld [vmem:[%s2630_s1 + $0xf8] sm:$0xff]   ;;  %v16_v36 = vld [vmem:[%s2631_s0 + $0x8] sm:$0xff] }
   0xc   :  { %1787 = vmatprep.subr.bf16.mxu0 %v1991_v12  ;;  %v2006_v27 = vld [vmem:[%s2630_s1 + $0xb0] sm:$0xff]   ;;  %v2012_v34 = vld [vmem:[%s2630_s1 + $0xb8] sm:$0xff]   ;;  %1278 = vmatprep.mubr.bf16.mxu0 %v1619_v33  ;;  %v1620_v37 = vcombine.low %v16_v36, %v16_v36  ;;  %v1621_v38 = vcombine.high %v16_v36, %v16_v36  ;;  %v2016_v39 = vld [vmem:[%s2630_s1 + $0x100] sm:$0xff]  }
   0xd   :  { %1808 = vmatpush3.bf16.msra.mxu1 %v1990_v11  ;;  %v2017_v40 = vld [vmem:[%s2630_s1 + $0x1c0] sm:$0xff]   ;;  %v2019_v42 = vld [vmem:[%s2630_s1 + $0x148] sm:$0xff]   ;;  %v2023_v46 = vld [vmem:[%s2630_s1 + $0x150] sm:$0xff]  }
   0xe   :  { %1809 = vmatprep.subr.bf16.mxu1 %v1993_v14  ;;  %1318 = vmatprep.mubr.bf16.mxu1 %v1621_v38  ;;  %v2018_v41 = vld [vmem:[%s2630_s1 + $0x180] sm:$0xff]   ;;  %v2020_v43 = vld [vmem:[%s2630_s1 + $0x108] sm:$0xff]   ;;  %v2024_v47 = vld [vmem:[%s2630_s1 + $0x110] sm:$0xff]  }
   0xf   :  { %1788 = vmatpush3.bf16.msra.mxu0 %v1992_v13  ;;  %v2021_v44 = vld [vmem:[%s2630_s1 + $0x1c8] sm:$0xff]   ;;  %v2025_v48 = vld [vmem:[%s2630_s1 + $0x1d0] sm:$0xff]   ;;  %v2027_v50 = vld [vmem:[%s2630_s1 + $0x158] sm:$0xff]  }
  0x10   :  { %1789 = vmatprep.subr.bf16.mxu0 %v1995_v16  ;;  %v2022_v45 = vld [vmem:[%s2630_s1 + $0x188] sm:$0xff]   ;;  %v2026_v49 = vld [vmem:[%s2630_s1 + $0x190] sm:$0xff]   ;;  %v2028_v51 = vld [vmem:[%s2630_s1 + $0x118] sm:$0xff]  }
  0x11   :  { %1810 = vmatpush3.bf16.msra.mxu1 %v1994_v15  ;;  %v2029_v52 = vld [vmem:[%s2630_s1 + $0x1d8] sm:$0xff]   ;;  %v2031_v54 = vld [vmem:[%s2630_s1 + $0x160] sm:$0xff]   ;;  %v2035_v58 = vld [vmem:[%s2630_s1 + $0x168] sm:$0xff]  }
  0x12   :  { %1811 = vmatprep.subr.bf16.mxu1 %v1997_v18  ;;  %v2030_v53 = vld [vmem:[%s2630_s1 + $0x198] sm:$0xff]   ;;  %v2032_v55 = vld [vmem:[%s2630_s1 + $0x120] sm:$0xff]   ;;  %v2036_v59 = vld [vmem:[%s2630_s1 + $0x128] sm:$0xff]  }
  0x13   :  { %1790 = vmatpush3.bf16.msra.mxu0 %v1996_v17  ;;  %v2033_v56 = vld [vmem:[%s2630_s1 + $0x1e0] sm:$0xff]   ;;  %v2037_v60 = vld [vmem:[%s2630_s1 + $0x1e8] sm:$0xff]   ;;  %v2039_v62 = vld [vmem:[%s2630_s1 + $0x170] sm:$0xff]  }
  0x14   :  { %1791 = vmatprep.subr.bf16.mxu0 %v1999_v20  ;;  %v2034_v57 = vld [vmem:[%s2630_s1 + $0x1a0] sm:$0xff]   ;;  %v2038_v61 = vld [vmem:[%s2630_s1 + $0x1a8] sm:$0xff]   ;;  %v2040_v63 = vld [vmem:[%s2630_s1 + $0x130] sm:$0xff]  }
  0x15   :  { %1812 = vmatpush3.bf16.msra.mxu1 %v1998_v19  ;;  %v2041_v0 = vld [vmem:[%s2630_s1 + $0x1f0] sm:$0xff]   ;;  %v2043_v2 = vld [vmem:[%s2630_s1 + $0x178] sm:$0xff]   ;;  %v2049_v9 = vld [vmem:[%s2630_s1 + $0x240] sm:$0xff]  }
  0x16   :  { %1813 = vmatprep.subr.bf16.mxu1 %v2001_v22  ;;  %v2042_v1 = vld [vmem:[%s2630_s1 + $0x1b0] sm:$0xff]   ;;  %v2044_v3 = vld [vmem:[%s2630_s1 + $0x138] sm:$0xff]   ;;  %v2052_v13 = vld [vmem:[%s2630_s1 + $0x200] sm:$0xff]  }
  0x17   :  { %1792 = vmatpush3.bf16.msra.mxu0 %v2000_v21  ;;  %v2045_v4 = vld [vmem:[%s2630_s1 + $0x1f8] sm:$0xff]   ;;  %v17_v5 = vld [vmem:[%s2631_s0 + $0x10] sm:$0xff]  ;;  %v2053_v14 = vld [vmem:[%s2630_s1 + $0x2c0] sm:$0xff]  }
  0x18   :  { %1793 = vmatprep.subr.bf16.mxu0 %v2003_v24  ;;  %v1622_v6 = vcombine.low %v17_v5, %v17_v5  ;;  %v1623_v7 = vcombine.high %v17_v5, %v17_v5  ;;  %v2048_v8 = vld [vmem:[%s2630_s1 + $0x1b8] sm:$0xff]   ;;  %v2054_v15 = vld [vmem:[%s2630_s1 + $0x280] sm:$0xff]   ;;  %v2055_v16 = vld [vmem:[%s2630_s1 + $0x248] sm:$0xff]  }
  0x19   :  { %1814 = vmatpush3.bf16.msra.mxu1 %v2002_v23  ;;  %v18_v10 = vld [vmem:[%s2631_s0 + $0x18] sm:$0xff]  ;;  %v2056_v17 = vld [vmem:[%s2630_s1 + $0x208] sm:$0xff]   ;;  %v2059_v20 = vld [vmem:[%s2630_s1 + $0x250] sm:$0xff]  }
  0x1a   :  { %1815 = vmatprep.subr.bf16.mxu1 %v2005_v26  ;;  %v1624_v11 = vcombine.low %v18_v10, %v18_v10  ;;  %v1625_v12 = vcombine.high %v18_v10, %v18_v10  ;;  %v2057_v18 = vld [vmem:[%s2630_s1 + $0x2c8] sm:$0xff]   ;;  %v2060_v21 = vld [vmem:[%s2630_s1 + $0x210] sm:$0xff]   ;;  %v2063_v24 = vld [vmem:[%s2630_s1 + $0x258] sm:$0xff]  }
  0x1b   :  { %1794 = vmatpush3.bf16.msra.mxu0 %v2004_v25  ;;  %v2058_v19 = vld [vmem:[%s2630_s1 + $0x288] sm:$0xff]   ;;  %v2061_v22 = vld [vmem:[%s2630_s1 + $0x2d0] sm:$0xff]   ;;  %v2064_v25 = vld [vmem:[%s2630_s1 + $0x218] sm:$0xff]  }
  0x1c   :  { %1795 = vmatprep.subr.bf16.mxu0 %v2007_v28  ;;  %v2062_v23 = vld [vmem:[%s2630_s1 + $0x290] sm:$0xff]   ;;  %v2065_v26 = vld [vmem:[%s2630_s1 + $0x2d8] sm:$0xff]   ;;  %v2067_v28 = vld [vmem:[%s2630_s1 + $0x260] sm:$0xff]  }
  0x1d   :  { %1816 = vmatpush3.bf16.msra.mxu1 %v2006_v27  ;;  %v2066_v27 = vld [vmem:[%s2630_s1 + $0x298] sm:$0xff]   ;;  %v2070_v31 = vld [vmem:[%s2630_s1 + $0x2a0] sm:$0xff]   ;;  %v2072_v33 = vld [vmem:[%s2630_s1 + $0x228] sm:$0xff]  }
  0x1e   :  { %1817 = vmatprep.subr.bf16.mxu1 %v2009_v30  ;;  %v2069_v30 = vld [vmem:[%s2630_s1 + $0x2e0] sm:$0xff]   ;;  %v2075_v36 = vld [vmem:[%s2630_s1 + $0x270] sm:$0xff]  }
  0x1f   :  { %1796 = vmatpush3.bf16.msra.mxu0 %v2008_v29  ;;  %v2068_v29 = vld [vmem:[%s2630_s1 + $0x220] sm:$0xff]   ;;  %v2077_v38 = vld [vmem:[%s2630_s1 + $0x2f0] sm:$0xff]  }
  0x20   :  { %1825 = vmatprep.subr.bf16.mxu0 %v2013_v35  ;;  %v2074_v35 = vld [vmem:[%s2630_s1 + $0x2a8] sm:$0xff]   ;;  %v2106_v5 = vld [vmem:[%s2630_s1 + $0x3a0] sm:$0xff]   ;;  %v2111_v10 = vld [vmem:[%s2630_s1 + $0x370] sm:$0xff]  }
  0x21   :  { %1818 = vmatpush3.bf16.msra.mxu1 %v2012_v34  ;;  %v2073_v34 = vld [vmem:[%s2630_s1 + $0x2e8] sm:$0xff]  }
  0x22   :  { %1279 = vmatmul.mubr.bf16.vlgmr.msra.gmra.mrb[0].mxu0 %v1618_v32  ;;  %1847 = vmatprep.subr.bf16.mxu1 %v2017_v40  ;;  %v2071_v32 = vld [vmem:[%s2630_s1 + $0x268] sm:$0xff]   ;;  %v2079_v40 = vld [vmem:[%s2630_s1 + $0x278] sm:$0xff]  }
  0x23   :  { %1826 = vmatpush3.bf16.msra.mxu0 %v2016_v39  ;;  %1358 = vmatprep.mubr.bf16.mxu0 %v1623_v7  ;;  %v2078_v39 = vld [vmem:[%s2630_s1 + $0x2b0] sm:$0xff]   ;;  %v2108_v7 = vld [vmem:[%s2630_s1 + $0x328] sm:$0xff]  }
  0x24   :  { %1319 = vmatmul.mubr.bf16.vlgmr.msra.gmra.mrb[0].mxu1 %v1620_v37  ;;  %1827 = vmatprep.subr.bf16.mxu0 %v2019_v42  ;;  %v2076_v37 = vld [vmem:[%s2630_s1 + $0x230] sm:$0xff]   ;;  %v2081_v42 = vld [vmem:[%s2630_s1 + $0x2f8] sm:$0xff]  }
  0x25   :  { %1848 = vmatpush3.bf16.msra.mxu1 %v2018_v41  ;;  %1398 = vmatprep.mubr.bf16.mxu1 %v1625_v12  ;;  %v2080_v41 = vld [vmem:[%s2630_s1 + $0x238] sm:$0xff]   ;;  %v2113_v12 = vld [vmem:[%s2630_s1 + $0x3f0] sm:$0xff]  }
  0x26   :  { %1849 = vmatprep.subr.bf16.mxu1 %v2021_v44 }
  0x27   :  { %1828 = vmatpush3.bf16.msra.mxu0 %v2020_v43  ;;  %v19_v43 = vld [vmem:[%s2631_s0 + $0x20] sm:$0xff] }
  0x28   :  { %1829 = vmatprep.subr.bf16.mxu0 %v2023_v46  ;;  %v1626_v44 = vcombine.low %v19_v43, %v19_v43  ;;  %v2084_v46 = vld [vmem:[%s2630_s1 + $0x2b8] sm:$0xff]  }
  0x29   :  { %1850 = vmatpush3.bf16.msra.mxu1 %v2022_v45  ;;  %v1627_v45 = vcombine.high %v19_v43, %v19_v43 }
  0x2a   :  { %1851 = vmatprep.subr.bf16.mxu1 %v2025_v48  ;;  %v20_v48 = vld [vmem:[%s2631_s0 + $0x28] sm:$0xff] }
  0x2b   :  { %1830 = vmatpush3.bf16.msra.mxu0 %v2024_v47  ;;  %v2085_v47 = vld [vmem:[%s2630_s1 + $0x340] sm:$0xff]  }
  0x2c   :  { %1831 = vmatprep.subr.bf16.mxu0 %v2027_v50  ;;  %v1629_v50 = vcombine.high %v20_v48, %v20_v48 }
  0x2d   :  { %1852 = vmatpush3.bf16.msra.mxu1 %v2026_v49  ;;  %v1628_v49 = vcombine.low %v20_v48, %v20_v48 }
  0x2e   :  { %1853 = vmatprep.subr.bf16.mxu1 %v2029_v52  ;;  %v2089_v52 = vld [vmem:[%s2630_s1 + $0x3c0] sm:$0xff]  }
  0x2f   :  { %1832 = vmatpush3.bf16.msra.mxu0 %v2028_v51  ;;  %v2088_v51 = vld [vmem:[%s2630_s1 + $0x300] sm:$0xff]  }
  0x30   :  { %1833 = vmatprep.subr.bf16.mxu0 %v2031_v54  ;;  %v2091_v54 = vld [vmem:[%s2630_s1 + $0x348] sm:$0xff]  }
  0x31   :  { %1854 = vmatpush3.bf16.msra.mxu1 %v2030_v53  ;;  %v2090_v53 = vld [vmem:[%s2630_s1 + $0x380] sm:$0xff]  }
  0x32   :  { %1855 = vmatprep.subr.bf16.mxu1 %v2033_v56  ;;  %v2093_v56 = vld [vmem:[%s2630_s1 + $0x3c8] sm:$0xff]  }
  0x33   :  { %1834 = vmatpush3.bf16.msra.mxu0 %v2032_v55  ;;  %v2092_v55 = vld [vmem:[%s2630_s1 + $0x308] sm:$0xff]  }
  0x34   :  { %1835 = vmatprep.subr.bf16.mxu0 %v2035_v58  ;;  %v2095_v58 = vld [vmem:[%s2630_s1 + $0x350] sm:$0xff]  }
  0x35   :  { %1856 = vmatpush3.bf16.msra.mxu1 %v2034_v57  ;;  %v2094_v57 = vld [vmem:[%s2630_s1 + $0x388] sm:$0xff]  }
  0x36   :  { %1857 = vmatprep.subr.bf16.mxu1 %v2037_v60  ;;  %v2097_v60 = vld [vmem:[%s2630_s1 + $0x3d0] sm:$0xff]  }
  0x37   :  { %1836 = vmatpush3.bf16.msra.mxu0 %v2036_v59  ;;  %v2096_v59 = vld [vmem:[%s2630_s1 + $0x310] sm:$0xff]  }
  0x38   :  { %1837 = vmatprep.subr.bf16.mxu0 %v2039_v62  ;;  %v2099_v62 = vld [vmem:[%s2630_s1 + $0x358] sm:$0xff]  }
  0x39   :  { %1858 = vmatpush3.bf16.msra.mxu1 %v2038_v61  ;;  %v2098_v61 = vld [vmem:[%s2630_s1 + $0x390] sm:$0xff]  }
  0x3a   :  { %1859 = vmatprep.subr.bf16.mxu1 %v2041_v0  ;;  %v2101_v0 = vld [vmem:[%s2630_s1 + $0x3d8] sm:$0xff]  }
  0x3b   :  { %1838 = vmatpush3.bf16.msra.mxu0 %v2040_v63  ;;  %v2100_v63 = vld [vmem:[%s2630_s1 + $0x318] sm:$0xff]  }
  0x3c   :  { %1839 = vmatprep.subr.bf16.mxu0 %v2043_v2  ;;  %v2103_v2 = vld [vmem:[%s2630_s1 + $0x360] sm:$0xff]  }
  0x3d   :  { %1860 = vmatpush3.bf16.msra.mxu1 %v2042_v1  ;;  %v2102_v1 = vld [vmem:[%s2630_s1 + $0x398] sm:$0xff]  }
  0x3e   :  { %1861 = vmatprep.subr.bf16.mxu1 %v2045_v4  ;;  %v2105_v4 = vld [vmem:[%s2630_s1 + $0x3e0] sm:$0xff]  }
  0x3f   :  { %1840 = vmatpush3.bf16.msra.mxu0 %v2044_v3  ;;  %v2104_v3 = vld [vmem:[%s2630_s1 + $0x320] sm:$0xff]  }
  0x40   :  { %1869 = vmatprep.subr.bf16.mxu0 %v2049_v9  ;;  %v2110_v9 = vld [vmem:[%s2630_s1 + $0x3a8] sm:$0xff]  }
  0x41   :  { %1862 = vmatpush3.bf16.msra.mxu1 %v2048_v8  ;;  %v2109_v8 = vld [vmem:[%s2630_s1 + $0x3e8] sm:$0xff]  }
  0x42   :  { %1359 = vmatmul.mubr.bf16.vlgmr.msra.gmra.mrb[4].mxu0 %v1622_v6  ;;  %1891 = vmatprep.subr.bf16.mxu1 %v2053_v14  ;;  %v2107_v6 = vld [vmem:[%s2630_s1 + $0x368] sm:$0xff]   ;;  %v2115_v14 = vld [vmem:[%s2630_s1 + $0x378] sm:$0xff]  }
  0x43   :  { %1870 = vmatpush3.bf16.msra.mxu0 %v2052_v13  ;;  %1438 = vmatprep.mubr.bf16.mxu0 %v1627_v45  ;;  %v2114_v13 = vld [vmem:[%s2630_s1 + $0x3b0] sm:$0xff]  }
  0x44   :  { %1399 = vmatmul.mubr.bf16.vlgmr.msra.gmra.mrb[4].mxu1 %v1624_v11  ;;  %1871 = vmatprep.subr.bf16.mxu0 %v2055_v16  ;;  %v2112_v11 = vld [vmem:[%s2630_s1 + $0x330] sm:$0xff]   ;;  %v2117_v16 = vld [vmem:[%s2630_s1 + $0x3f8] sm:$0xff]  }
  0x45   :  { %1892 = vmatpush3.bf16.msra.mxu1 %v2054_v15  ;;  %1478 = vmatprep.mubr.bf16.mxu1 %v1629_v50  ;;  %v2116_v15 = vld [vmem:[%s2630_s1 + $0x338] sm:$0xff]  }
  0x46   :  { %1893 = vmatprep.subr.bf16.mxu1 %v2057_v18 }
  0x47   :  { %1872 = vmatpush3.bf16.msra.mxu0 %v2056_v17  ;;  %v21_v17 = vld [vmem:[%s2631_s0 + $0x30] sm:$0xff] }
  0x48   :  { %1873 = vmatprep.subr.bf16.mxu0 %v2059_v20  ;;  %v1630_v18 = vcombine.low %v21_v17, %v21_v17  ;;  %v2120_v20 = vld [vmem:[%s2630_s1 + $0x3b8] sm:$0xff]  }
  0x49   :  { %1894 = vmatpush3.bf16.msra.mxu1 %v2058_v19  ;;  %v1631_v19 = vcombine.high %v21_v17, %v21_v17 }
  0x4a   :  { %1895 = vmatprep.subr.bf16.mxu1 %v2061_v22  ;;  %v22_v22 = vld [vmem:[%s2631_s0 + $0x38] sm:$0xff] }
  0x4b   :  { %1874 = vmatpush3.bf16.msra.mxu0 %v2060_v21  ;;  %v2121_v21 = vld [vmem:[%s2630_s1 + $0x440] sm:$0xff]  }
  0x4c   :  { %1875 = vmatprep.subr.bf16.mxu0 %v2063_v24  ;;  %v1633_v24 = vcombine.high %v22_v22, %v22_v22 }
  0x4d   :  { %1896 = vmatpush3.bf16.msra.mxu1 %v2062_v23  ;;  %v1632_v23 = vcombine.low %v22_v22, %v22_v22 }
  0x4e   :  { %1897 = vmatprep.subr.bf16.mxu1 %v2065_v26  ;;  %v2125_v26 = vld [vmem:[%s2630_s1 + $0x448] sm:$0xff]  }
  0x4f   :  { %1876 = vmatpush3.bf16.msra.mxu0 %v2064_v25  ;;  %v2124_v25 = vld [vmem:[%s2630_s1 + $0x400] sm:$0xff]  }
  0x50   :  { %1877 = vmatprep.subr.bf16.mxu0 %v2067_v28  ;;  %v2127_v28 = vld [vmem:[%s2630_s1 + $0x450] sm:$0xff]  }
  0x51   :  { %1898 = vmatpush3.bf16.msra.mxu1 %v2066_v27  ;;  %v2126_v27 = vld [vmem:[%s2630_s1 + $0x408] sm:$0xff]  }
  0x52   :  { %1899 = vmatprep.subr.bf16.mxu1 %v2069_v30  ;;  %v2129_v30 = vld [vmem:[%s2630_s1 + $0x458] sm:$0xff]  }
  0x53   :  { %1878 = vmatpush3.bf16.msra.mxu0 %v2068_v29  ;;  %v2128_v29 = vld [vmem:[%s2630_s1 + $0x410] sm:$0xff]  }
  0x54   :  { %1879 = vmatprep.subr.bf16.mxu0 %v2071_v32  ;;  %v2131_v32 = vld [vmem:[%s2630_s1 + $0x460] sm:$0xff]  }
  0x55   :  { %1900 = vmatpush3.bf16.msra.mxu1 %v2070_v31  ;;  %v2130_v31 = vld [vmem:[%s2630_s1 + $0x418] sm:$0xff]  }
  0x56   :  { %1901 = vmatprep.subr.bf16.mxu1 %v2073_v34  ;;  %v23_v34 = vld [vmem:[%s2631_s0 + $0x40] sm:$0xff] }
  0x57   :  { %1880 = vmatpush3.bf16.msra.mxu0 %v2072_v33  ;;  %v2132_v33 = vld [vmem:[%s2630_s1 + $0x420] sm:$0xff]  }
  0x58   :  { %1881 = vmatprep.subr.bf16.mxu0 %v2075_v36  ;;  %v1635_v36 = vcombine.high %v23_v34, %v23_v34 }
  0x59   :  { %1902 = vmatpush3.bf16.msra.mxu1 %v2074_v35  ;;  %v2133_v35 = vld [vmem:[%s2630_s1 + $0x468] sm:$0xff]  }
  0x5a   :  { %1903 = vmatprep.subr.bf16.mxu1 %v2077_v38  ;;  %v2135_v38 = vld [vmem:[%s2630_s1 + $0x470] sm:$0xff]  }
  0x5b   :  { %1882 = vmatpush3.bf16.msra.mxu0 %v2076_v37  ;;  %v2134_v37 = vld [vmem:[%s2630_s1 + $0x428] sm:$0xff]  }
  0x5c   :  { %1883 = vmatprep.subr.bf16.mxu0 %v2079_v40  ;;  %v2137_v40 = vld [vmem:[%s2630_s1 + $0x478] sm:$0xff]  }
  0x5d   :  { %1904 = vmatpush3.bf16.msra.mxu1 %v2078_v39  ;;  %v2136_v39 = vld [vmem:[%s2630_s1 + $0x430] sm:$0xff]  }
  0x5e   :  { %1905 = vmatprep.subr.bf16.mxu1 %v2081_v42  ;;  %v1634_v42 = vcombine.low %v23_v34, %v23_v34 }
  0x5f   :  { %1884 = vmatpush3.bf16.msra.mxu0 %v2080_v41  ;;  %v2138_v41 = vld [vmem:[%s2630_s1 + $0x438] sm:$0xff]  }
  0x60   :  { %1913 = vmatprep.subr.bf16.mxu0 %v2085_v47 }
  0x61   :  { %1906 = vmatpush3.bf16.msra.mxu1 %v2084_v46 }
  0x62   :  { %1439 = vmatmul.mubr.bf16.vlgmr.msra.gmra.mrb[8].mxu0 %v1626_v44  ;;  %1935 = vmatprep.subr.bf16.mxu1 %v2089_v52  ;;  %v1617_v44 = vld [vmem:[%s2632_s2] ss:$0 sm:$0xff] }
  0x63   :  { %1914 = vmatpush3.bf16.msra.mxu0 %v2088_v51  ;;  %1518 = vmatprep.mubr.bf16.mxu0 %v1631_v19 }
  0x64   :  { %1479 = vmatmul.mubr.bf16.vlgmr.msra.gmra.mrb[8].mxu1 %v1628_v49  ;;  %1915 = vmatprep.subr.bf16.mxu0 %v2091_v54 }
  0x65   :  { %1936 = vmatpush3.bf16.msra.mxu1 %v2090_v53  ;;  %1558 = vmatprep.mubr.bf16.mxu1 %v1633_v24 }
  0x66   :  { %1937 = vmatprep.subr.bf16.mxu1 %v2093_v56 }
  0x67   :  { %1916 = vmatpush3.bf16.msra.mxu0 %v2092_v55 }
  0x68   :  { %1917 = vmatprep.subr.bf16.mxu0 %v2095_v58 }
  0x69   :  { %1938 = vmatpush3.bf16.msra.mxu1 %v2094_v57 }
  0x6a   :  { %1939 = vmatprep.subr.bf16.mxu1 %v2097_v60 }
  0x6b   :  { %1918 = vmatpush3.bf16.msra.mxu0 %v2096_v59 }
  0x6c   :  { %1919 = vmatprep.subr.bf16.mxu0 %v2099_v62 }
  0x6d   :  { %1940 = vmatpush3.bf16.msra.mxu1 %v2098_v61 }
  0x6e   :  { %1941 = vmatprep.subr.bf16.mxu1 %v2101_v0 }
  0x6f   :  { %1920 = vmatpush3.bf16.msra.mxu0 %v2100_v63 }
  0x70   :  { %1921 = vmatprep.subr.bf16.mxu0 %v2103_v2 }
  0x71   :  { %1942 = vmatpush3.bf16.msra.mxu1 %v2102_v1 }
  0x72   :  { %1943 = vmatprep.subr.bf16.mxu1 %v2105_v4 }
  0x73   :  { %1922 = vmatpush3.bf16.msra.mxu0 %v2104_v3 }
  0x74   :  { %1923 = vmatprep.subr.bf16.mxu0 %v2107_v6 }
  0x75   :  { %1944 = vmatpush3.bf16.msra.mxu1 %v2106_v5 }
  0x76   :  { %1945 = vmatprep.subr.bf16.mxu1 %v2109_v8 }
  0x77   :  { %1924 = vmatpush3.bf16.msra.mxu0 %v2108_v7 }
  0x78   :  { %1925 = vmatprep.subr.bf16.mxu0 %v2111_v10 }
  0x79   :  { %1946 = vmatpush3.bf16.msra.mxu1 %v2110_v9 }
  0x7a   :  { %1947 = vmatprep.subr.bf16.mxu1 %v2113_v12 }
  0x7b   :  { %1926 = vmatpush3.bf16.msra.mxu0 %v2112_v11 }
  0x7c   :  { %1927 = vmatprep.subr.bf16.mxu0 %v2115_v14 }
  0x7d   :  { %1948 = vmatpush3.bf16.msra.mxu1 %v2114_v13 }
  0x7e   :  { %1949 = vmatprep.subr.bf16.mxu1 %v2117_v16 }
  0x7f   :  { %1928 = vmatpush3.bf16.msra.mxu0 %v2116_v15 }
  0x80   :  { %1957 = vmatprep.subr.bf16.mxu0 %v2121_v21 }
  0x81   :  { %1950 = vmatpush3.bf16.msra.mxu1 %v2120_v20 }
  0x82   :  { %1519 = vmatmul.mubr.bf16.vlgmr.msra.gmra.mrb[12].mxu0 %v1630_v18 }
  0x83   :  { %1958 = vmatpush3.bf16.msra.mxu0 %v2124_v25  ;;  %1598 = vmatprep.mubr.bf16.mxu0 %v1635_v36 }
  0x84   :  { %1559 = vmatmul.mubr.bf16.vlgmr.msra.gmra.mrb[12].mxu1 %v1632_v23  ;;  %1959 = vmatprep.subr.bf16.mxu0 %v2125_v26 }
  0x87   :  { %1960 = vmatpush3.bf16.msra.mxu0 %v2126_v27 }
  0x88   :  { %1961 = vmatprep.subr.bf16.mxu0 %v2127_v28 }
  0x8b   :  { %1962 = vmatpush3.bf16.msra.mxu0 %v2128_v29 }
  0x8c   :  { %1963 = vmatprep.subr.bf16.mxu0 %v2129_v30 }
  0x8f   :  { %1964 = vmatpush3.bf16.msra.mxu0 %v2130_v31 }
  0x90   :  { %1965 = vmatprep.subr.bf16.mxu0 %v2131_v32 }
  0x93   :  { %1966 = vmatpush3.bf16.msra.mxu0 %v2132_v33 }
  0x94   :  { %1967 = vmatprep.subr.bf16.mxu0 %v2133_v35 }
  0x97   :  { %1968 = vmatpush3.bf16.msra.mxu0 %v2134_v37 }
  0x98   :  { %1969 = vmatprep.subr.bf16.mxu0 %v2135_v38 }
  0x9b   :  { %1970 = vmatpush3.bf16.msra.mxu0 %v2136_v39 }
  0x9c   :  { %1971 = vmatprep.subr.bf16.mxu0 %v2137_v40 }
  0x9f   :  { %1972 = vmatpush3.bf16.msra.mxu0 %v2138_v41 }
  0xa2   :  { %1599 = vmatmul.mubr.bf16.vlgmr.msra.gmra.mrb[16].mxu0 %v1634_v42 }
  0xf5   :  { %v1797_v43 = vpop.f32.mrb[0].mxu0 }
  0xf6   :  { %v1798_v45 = vpop.f32.mrb[1].mxu0 }
  0xf7   :  { %v1799_v46 = vadd.f32 %v1798_v45, %v1797_v43  ;;  %v1800_v47 = vpop.f32.mrb[2].mxu0  ;;  %v1819_v48 = vpop.f32.mrb[0].mxu1 }
  0xf8   :  { %v1801_v49 = vpop.f32.mrb[3].mxu0  ;;  %v1820_v50 = vpop.f32.mrb[1].mxu1 }
  0xf9   :  { %v1281_v51 = vadd.f32 %v1799_v46, %v1617_v44  ;;  %v1821_v52 = vadd.f32 %v1820_v50, %v1819_v48  ;;  %v1822_v53 = vpop.f32.mrb[2].mxu1 }
  0xfa   :  { %v1823_v54 = vpop.f32.mrb[3].mxu1 }
  0xfb   :  { %v1321_v55 = vadd.f32 %v1821_v52, %v1281_v51 }
 0x115   :  { %v1841_v56 = vpop.f32.mrb[4].mxu0 }
 0x116   :  { %v1842_v57 = vpop.f32.mrb[5].mxu0 }
 0x117   :  { %v1843_v58 = vadd.f32 %v1842_v57, %v1841_v56  ;;  %v1844_v59 = vpop.f32.mrb[6].mxu0  ;;  %v1863_v60 = vpop.f32.mrb[4].mxu1 }
 0x118   :  { %v1845_v61 = vpop.f32.mrb[7].mxu0  ;;  %v1864_v63 = vpop.f32.mrb[5].mxu1 }
 0x119   :  { %v1361_v62 = vadd.f32 %v1843_v58, %v1321_v55  ;;  %v1865_v0 = vadd.f32 %v1864_v63, %v1863_v60  ;;  %v1866_v1 = vpop.f32.mrb[6].mxu1 }
 0x11a   :  { %v1867_v2 = vpop.f32.mrb[7].mxu1 }
 0x11b   :  { %v1401_v3 = vadd.f32 %v1865_v0, %v1361_v62 }
 0x135   :  { %v1885_v4 = vpop.f32.mrb[8].mxu0 }
 0x136   :  { %v1886_v5 = vpop.f32.mrb[9].mxu0 }
 0x137   :  { %v1887_v6 = vadd.f32 %v1886_v5, %v1885_v4  ;;  %v1888_v7 = vpop.f32.mrb[10].mxu0  ;;  %v1907_v8 = vpop.f32.mrb[8].mxu1 }
 0x138   :  { %v1889_v9 = vpop.f32.mrb[11].mxu0  ;;  %v1908_v10 = vpop.f32.mrb[9].mxu1 }
 0x139   :  { %v1441_v11 = vadd.f32 %v1887_v6, %v1401_v3  ;;  %v1909_v12 = vadd.f32 %v1908_v10, %v1907_v8  ;;  %v1910_v13 = vpop.f32.mrb[10].mxu1 }
 0x13a   :  { %v1911_v14 = vpop.f32.mrb[11].mxu1 }
 0x13b   :  { %v1481_v15 = vadd.f32 %v1909_v12, %v1441_v11 }
 0x155   :  { %v1929_v16 = vpop.f32.mrb[12].mxu0 }
 0x156   :  { %v1930_v17 = vpop.f32.mrb[13].mxu0 }
 0x157   :  { %v1931_v18 = vadd.f32 %v1930_v17, %v1929_v16  ;;  %v1932_v19 = vpop.f32.mrb[14].mxu0  ;;  %v1951_v20 = vpop.f32.mrb[12].mxu1 }
 0x158   :  { %v1933_v21 = vpop.f32.mrb[15].mxu0  ;;  %v1952_v22 = vpop.f32.mrb[13].mxu1 }
 0x159   :  { %v1521_v23 = vadd.f32 %v1931_v18, %v1481_v15  ;;  %v1953_v24 = vadd.f32 %v1952_v22, %v1951_v20  ;;  %v1954_v25 = vpop.f32.mrb[14].mxu1 }
 0x15a   :  { %v1955_v26 = vpop.f32.mrb[15].mxu1 }
 0x15b   :  { %v1561_v27 = vadd.f32 %v1953_v24, %v1521_v23 }
 0x175   :  { %v1973_v28 = vpop.f32.mrb[16].mxu0 }
 0x176   :  { %v1974_v29 = vpop.f32.mrb[17].mxu0 }
 0x177   :  { %v1975_v30 = vadd.f32 %v1974_v29, %v1973_v28  ;;  %v1976_v31 = vpop.f32.mrb[18].mxu0 }
 0x178   :  { %v1977_v32 = vpop.f32.mrb[19].mxu0 }
 0x179   :  { %v1601_v33 = vadd.f32 %v1975_v30, %v1561_v27 }
 0x17b   :  { %v1780_v34 = vmul.f32 -1.442695, %v1601_v33 }
 0x17d   :  { %2141 = vpow2.f32 %v1780_v34 }
 0x187   :  { %v2142_v35 = vpop.eup %2141 }
 0x188   :  { %v1609_v36 = vadd.f32 1.0, %v2142_v35 }
 0x18a   :  { %2143 = vrcp.f32 %v1609_v36 }
 0x194   :  { %v2144_v37 = vpop.eup %2143 }
 0x195   :  { %1612 = vst [vmem:[%s2633_s3] sm:$0xff] %v2144_v37 }

</bundles_post_ra>
